<compile_context>
chip_gen: v5e
topology: v5e:2x2
jax: 0.10.0
libtpu: 0.0.40
codegen_flags: <defaults>
</compile_context>

<pallas_src>
import functools
import math

import jax
import jax.numpy as jnp
from jax.experimental import pallas as pl
from jax.experimental.pallas import tpu as pltpu


def _layernorm(x, gamma, beta, eps=1e-5):
    # x: (rows, D); gamma/beta: (1, D). PyTorch nn.LayerNorm (biased variance).
    mean = jnp.mean(x, axis=-1, keepdims=True)
    var = jnp.mean((x - mean) ** 2, axis=-1, keepdims=True)
    return (x - mean) * jax.lax.rsqrt(var + eps) * gamma + beta


def perceiver_attention_kernel(
    x_ref, lat_ref, g1_ref, b1_ref, g2_ref, b2_ref,
    wq_ref, wkv_ref, wo_ref, o_ref,
    *, heads, dim_head, compute_dtype,
):
    f32 = jnp.float32
    cdt = compute_dtype
    bt, n1, d = x_ref.shape
    n2 = lat_ref.shape[1]
    n = n1 + n2
    inner = heads * dim_head

    # ---- LayerNorms (fp32 VPU math), rows flattened over (batch, seq) ----
    x = x_ref[...].reshape(bt * n1, d).astype(f32)
    lat = lat_ref[...].reshape(bt * n2, d).astype(f32)
    x_n = _layernorm(x, g1_ref[...].astype(f32), b1_ref[...].astype(f32)).astype(cdt)
    lat_n = _layernorm(lat, g2_ref[...].astype(f32), b2_ref[...].astype(f32)).astype(cdt)

    # ---- Q projection; full softmax scale (1/sqrt(dim_head)) applied once ----
    q = jnp.dot(lat_n, wq_ref[...], preferred_element_type=f32)       # (bt*n2, inner)
    q = q * (1.0 / math.sqrt(dim_head))

    # ---- fused KV projection: one (bt*(n1+n2), D) @ (D, 2*inner) MXU pass ----
    # sublane-stack x_n / lat_n per batch element (cheap VMEM copy), so Wkv is
    # streamed through the MXU exactly once per grid step.
    kv_in = jnp.concatenate(
        [x_n.reshape(bt, n1, d), lat_n.reshape(bt, n2, d)], axis=1
    ).reshape(bt * n, d)
    kv = jnp.dot(kv_in, wkv_ref[...], preferred_element_type=f32)     # (bt*n, 2*inner)
    k = kv[:, :inner]
    v = kv[:, inner:]

    # ---- head split: (rows, inner) -> (bt*heads, len, dim_head) ----
    def to_heads(t, length):
        t = t.astype(cdt).reshape(bt, length, heads, dim_head)
        t = jnp.transpose(t, (0, 2, 1, 3))
        return t.reshape(bt * heads, length, dim_head)

    q3 = to_heads(q, n2)          # (bt*h, n2, dh)
    k3 = to_heads(k, n)           # (bt*h, n,  dh)
    v3 = to_heads(v, n)           # (bt*h, n,  dh)

    # ---- attention: single fused score tensor over all (batch, head) pairs ----
    s = jnp.einsum("bqd,bkd->bqk", q3, k3, preferred_element_type=f32)   # (bt*h, n2, n)
    m = jnp.max(s, axis=-1, keepdims=True)
    p = jnp.exp(s - m)
    denom = jnp.sum(p, axis=-1, keepdims=True)
    out3 = jnp.einsum("bqk,bkd->bqd", p.astype(cdt), v3,
                      preferred_element_type=f32)                        # (bt*h, n2, dh)
    # softmax denominator applied post-PV on the small (n2, dh) tensor; EUP slot
    out3 = out3 * pl.reciprocal(denom, approx=True)

    # ---- merge heads + output projection: one K=inner MXU pass ----
    out = out3.reshape(bt, heads, n2, dim_head)
    out = jnp.transpose(out, (0, 2, 1, 3)).reshape(bt * n2, inner).astype(cdt)
    o = jnp.dot(out, wo_ref[...], preferred_element_type=f32)           # (bt*n2, d)
    o_ref[...] = o.reshape(bt, n2, d).astype(o_ref.dtype)


@functools.lru_cache(maxsize=1)
def _single_buffer_weights_supported():
    """One-time capability probe: does this jax/TPU accept
    pipeline_mode=pl.Buffered(1) on a constant-index BlockSpec?  A tiny kernel
    is compiled (not run); real-kernel failures are never swallowed."""
    if not hasattr(pl, "Buffered"):
        return False
    try:
        w_spec = pl.BlockSpec((8, 128), lambda i: (0, 0),
                              pipeline_mode=pl.Buffered(1))

        def _probe(w_ref, o_ref):
            o_ref[...] = w_ref[...]

        fn = pl.pallas_call(
            _probe,
            out_shape=jax.ShapeDtypeStruct((16, 128), jnp.float32),
            grid=(2,),
            in_specs=[w_spec],
            out_specs=pl.BlockSpec((8, 128), lambda i: (i, 0)),
        )
        jax.jit(fn).lower(jax.ShapeDtypeStruct((8, 128), jnp.float32)).compile()
        return True
    except Exception:
        return False


def _vmem_limit_bytes():
    # Generation-aware VMEM budget: v5e/v6e have 128 MiB, v7x only 64 MiB/TC.
    cap = 64 * 1024 * 1024  # conservative default (v7x per-TensorCore)
    try:
        cap = int(getattr(pltpu.get_tpu_info(), "vmem_capacity_bytes", cap))
    except Exception:
        pass
    return min(96 * 1024 * 1024, (cap * 3) // 4)


def _pick_block_b(b, *, per_batch_bytes, weight_bytes, vmem_limit_bytes,
                  max_block=8):
    """Largest divisor of b that (a) keeps weights + Bt x activations inside the
    VMEM budget and (b) keeps >=2 parallel grid steps when b allows (2-TC chips)."""
    budget = max(vmem_limit_bytes - 2 * weight_bytes, vmem_limit_bytes // 4)
    cap = int(max(1, min(max_block, budget // max(per_batch_bytes, 1) // 2)))
    best = 1
    for cand in range(1, min(b, cap) + 1):
        if b % cand == 0:
            best = cand
    if b // best < 2 <= b:
        for cand in range(best - 1, 0, -1):
            if b % cand == 0 and b // cand >= 2:
                best = cand
                break
    return best


def perceiver_attention(x, latents, params, *, heads, dim_head,
                        block_b=None, mxu_dtype=None):
    b, n1, d = x.shape
    _, n2, _ = latents.shape
    inner = heads * dim_head
    n = n1 + n2
    f32 = jnp.float32
    cdt = jnp.dtype(mxu_dtype) if mxu_dtype is not None else x.dtype

    # TODO(synk): pad n1/n2 (with key masking) to sublane multiples for
    # unaligned sequence lengths; test/production shapes are already aligned.

    # ---- parameter prep (weights cast to the MXU compute dtype) ----
    g1 = params["g1"].reshape(1, d).astype(f32)
    b1 = params["b1"].reshape(1, d).astype(f32)
    g2 = params["g2"].reshape(1, d).astype(f32)
    b2 = params["b2"].reshape(1, d).astype(f32)
    wq = params["wq"].astype(cdt)          # (d, inner)
    wkv = params["wkv"].astype(cdt)        # (d, 2*inner), chunk order: k then v
    wo = params["wo"].astype(cdt)          # (inner, d)

    # ---- VMEM budget & batch-block size ----
    itemsize = jnp.dtype(cdt).itemsize
    weight_bytes = (d * inner + d * 2 * inner + inner * d) * itemsize + 4 * d * 4
    per_batch_bytes = 4 * (
        2 * n * d                # LN'd activations / kv_in
        + n2 * inner             # q
        + 2 * n * inner          # k, v
        + 2 * heads * n2 * n     # scores + exp
        + 2 * n2 * inner         # attention out + merged heads
        + n2 * d                 # projected output
    ) + 2 * jnp.dtype(x.dtype).itemsize * (n1 + 2 * n2) * d   # pipelined I/O blocks

    vmem_limit = _vmem_limit_bytes()
    if block_b is None:
        bt = _pick_block_b(b, per_batch_bytes=per_batch_bytes,
                           weight_bytes=weight_bytes,
                           vmem_limit_bytes=vmem_limit)
    else:
        bt = block_b
    if b % bt != 0:
        raise ValueError(f"block_b={bt} must divide batch size {b}")

    single_buffer = _single_buffer_weights_supported()

    def const_spec(shape):
        ndim = len(shape)
        index_map = lambda i, _n=ndim: (0,) * _n
        if single_buffer:
            # constant block index across the grid -> one VMEM copy is enough
            return pl.BlockSpec(shape, index_map, pipeline_mode=pl.Buffered(1))
        return pl.BlockSpec(shape, index_map)

    kernel = functools.partial(
        perceiver_attention_kernel,
        heads=heads, dim_head=dim_head, compute_dtype=cdt,
    )

    call = pl.pallas_call(
        kernel,
        out_shape=jax.ShapeDtypeStruct((b, n2, d), x.dtype),
        grid_spec=pltpu.PrefetchScalarGridSpec(
            num_scalar_prefetch=0,
            grid=(b // bt,),
            in_specs=[
                pl.BlockSpec((bt, n1, d), lambda i: (i, 0, 0)),   # x
                pl.BlockSpec((bt, n2, d), lambda i: (i, 0, 0)),   # latents
                const_spec((1, d)),                               # gamma1
                const_spec((1, d)),                               # beta1
                const_spec((1, d)),                               # gamma2
                const_spec((1, d)),                               # beta2
                const_spec((d, inner)),                           # Wq
                const_spec((d, 2 * inner)),                       # Wkv (fused)
                const_spec((inner, d)),                           # Wo
            ],
            out_specs=pl.BlockSpec((bt, n2, d), lambda i: (i, 0, 0)),
        ),
        compiler_params=pltpu.CompilerParams(
            dimension_semantics=("parallel",),
            vmem_limit_bytes=int(vmem_limit),
        ),
    )
    return call(x, latents, g1, b1, g2, b2, wq, wkv, wo)


def perceiver_attention_ref(x, latents, params, *, heads, dim_head):
    """Pure-JAX reference mirroring the PyTorch forward exactly."""
    inner = heads * dim_head

    def ln(t, g, b, eps=1e-5):
        mean = jnp.mean(t, axis=-1, keepdims=True)
        var = jnp.mean((t - mean) ** 2, axis=-1, keepdims=True)
        return (t - mean) / jnp.sqrt(var + eps) * g + b

    x_n = ln(x, params["g1"], params["b1"])
    lat_n = ln(latents, params["g2"], params["b2"])
    bsz, l, _ = lat_n.shape

    q = lat_n @ params["wq"]                                  # (b, n2, inner)
    kv_in = jnp.concatenate([x_n, lat_n], axis=-2)
    kv = kv_in @ params["wkv"]
    k, v = kv[..., :inner], kv[..., inner:]

    def split_heads(t):
        bs, length, _ = t.shape
        return t.reshape(bs, length, heads, -1).transpose(0, 2, 1, 3)

    q, k, v = split_heads(q), split_heads(k), split_heads(v)
    scale = 1.0 / math.sqrt(math.sqrt(dim_head))
    w = jnp.einsum("bhqd,bhkd->bhqk", q * scale, k * scale)
    w = jax.nn.softmax(w.astype(jnp.float32), axis=-1).astype(w.dtype)
    out = jnp.einsum("bhqk,bhkd->bhqd", w, v)
    out = out.transpose(0, 2, 1, 3).reshape(bsz, l, -1)
    return out @ params["wo"]


if __name__ == "__main__":
    # Small shapes consistent with the module's forward
    B, N1, N2 = 4, 16, 8
    DIM, HEADS, DIM_HEAD = 32, 4, 8
    INNER = HEADS * DIM_HEAD

    key = jax.random.PRNGKey(0)
    ks = jax.random.split(key, 9)

    x = jax.random.normal(ks[0], (B, N1, DIM), dtype=jnp.float32)
    latents = jax.random.normal(ks[1], (B, N2, DIM), dtype=jnp.float32)

    params = {
        # LayerNorm params (nontrivial but deterministic)
        "g1": 1.0 + 0.1 * jax.random.normal(ks[2], (DIM,), dtype=jnp.float32),
        "b1": 0.1 * jax.random.normal(ks[3], (DIM,), dtype=jnp.float32),
        "g2": 1.0 + 0.1 * jax.random.normal(ks[4], (DIM,), dtype=jnp.float32),
        "b2": 0.1 * jax.random.normal(ks[5], (DIM,), dtype=jnp.float32),
        # Linear weights stored as (in, out); PyTorch applies x @ W.T with W (out, in)
        "wq": 0.05 * jax.random.normal(ks[6], (DIM, INNER), dtype=jnp.float32),
        "wkv": 0.05 * jax.random.normal(ks[7], (DIM, 2 * INNER), dtype=jnp.float32),
        "wo": 0.05 * jax.random.normal(ks[8], (INNER, DIM), dtype=jnp.float32),
    }

    ref = perceiver_attention_ref(x, latents, params, heads=HEADS, dim_head=DIM_HEAD)

    # fp32 path (tight tolerance; only the approx EUP reciprocal deviates)
    out = perceiver_attention(x, latents, params, heads=HEADS, dim_head=DIM_HEAD)
    out = jax.block_until_ready(out)
    assert out.shape == (B, N2, DIM)
    assert jnp.allclose(out, ref, atol=3e-3, rtol=3e-3), (
        "Pallas fp32 output mismatch vs pure-JAX reference"
    )

    # bf16-MXU path (v6e/v7x perf path): weights + matmul operands in bf16,
    # LN/softmax math stays fp32, fp32 MXU accumulation, fp32 output.
    out_bf16 = perceiver_attention(x, latents, params, heads=HEADS,
                                   dim_head=DIM_HEAD, mxu_dtype=jnp.bfloat16)
    out_bf16 = jax.block_until_ready(out_bf16)
    assert jnp.allclose(out_bf16, ref, atol=5e-2, rtol=5e-2), (
        "Pallas bf16-MXU output mismatch vs pure-JAX reference"
    )

    print("KERNEL_OK")
</pallas_src>

<mosaic_0001>
module attributes {stable_mosaic.version = 11 : i64} {
  func.func @perceiver_attention_kernel(%arg0: i32, %arg1: memref<2x16x32xf32, #tpu.memory_space<vmem>>, %arg2: memref<2x8x32xf32, #tpu.memory_space<vmem>>, %arg3: memref<1x32xf32, #tpu.memory_space<vmem>>, %arg4: memref<1x32xf32, #tpu.memory_space<vmem>>, %arg5: memref<1x32xf32, #tpu.memory_space<vmem>>, %arg6: memref<1x32xf32, #tpu.memory_space<vmem>>, %arg7: memref<32x32xf32, #tpu.memory_space<vmem>>, %arg8: memref<32x64xf32, #tpu.memory_space<vmem>>, %arg9: memref<32x32xf32, #tpu.memory_space<vmem>>, %arg10: memref<2x8x32xf32, #tpu.memory_space<vmem>>) attributes {dimension_semantics = [#tpu.dimension_semantics<parallel>], iteration_bounds = array<i64: 2>, scalar_prefetch = 0 : i64, scratch_operands = 0 : i64, tpu.core_type = #tpu.core_type<tc>, window_params = [{transform_indices = @transform_0, window_bounds = array<i64: 2, 16, 32>}, {transform_indices = @transform_1, window_bounds = array<i64: 2, 8, 32>}, {pipeline_mode = #tpu.pipeline_mode<synchronous>, transform_indices = @transform_2, window_bounds = array<i64: 1, 32>}, {pipeline_mode = #tpu.pipeline_mode<synchronous>, transform_indices = @transform_3, window_bounds = array<i64: 1, 32>}, {pipeline_mode = #tpu.pipeline_mode<synchronous>, transform_indices = @transform_4, window_bounds = array<i64: 1, 32>}, {pipeline_mode = #tpu.pipeline_mode<synchronous>, transform_indices = @transform_5, window_bounds = array<i64: 1, 32>}, {pipeline_mode = #tpu.pipeline_mode<synchronous>, transform_indices = @transform_6, window_bounds = array<i64: 32, 32>}, {pipeline_mode = #tpu.pipeline_mode<synchronous>, transform_indices = @transform_7, window_bounds = array<i64: 32, 64>}, {pipeline_mode = #tpu.pipeline_mode<synchronous>, transform_indices = @transform_8, window_bounds = array<i64: 32, 32>}, {transform_indices = @transform_9, window_bounds = array<i64: 2, 8, 32>}]} {
    %c0 = arith.constant 0 : index
    %c0_0 = arith.constant 0 : index
    %c0_1 = arith.constant 0 : index
    %0 = vector.load %arg1[%c0, %c0_0, %c0_1] : memref<2x16x32xf32, #tpu.memory_space<vmem>>, vector<2x16x32xf32>
    %1 = vector.shape_cast %0 : vector<2x16x32xf32> to vector<32x32xf32>
    %c0_2 = arith.constant 0 : index
    %c0_3 = arith.constant 0 : index
    %c0_4 = arith.constant 0 : index
    %2 = vector.load %arg2[%c0_2, %c0_3, %c0_4] : memref<2x8x32xf32, #tpu.memory_space<vmem>>, vector<2x8x32xf32>
    %3 = vector.shape_cast %2 : vector<2x8x32xf32> to vector<16x32xf32>
    %c0_5 = arith.constant 0 : index
    %c0_6 = arith.constant 0 : index
    %4 = vector.load %arg3[%c0_5, %c0_6] : memref<1x32xf32, #tpu.memory_space<vmem>>, vector<1x32xf32>
    %c0_7 = arith.constant 0 : index
    %c0_8 = arith.constant 0 : index
    %5 = vector.load %arg4[%c0_7, %c0_8] : memref<1x32xf32, #tpu.memory_space<vmem>>, vector<1x32xf32>
    %cst = arith.constant dense<0.000000e+00> : vector<32xf32>
    %6 = vector.multi_reduction <add>, %1, %cst [1] : vector<32x32xf32> to vector<32xf32>
    %7 = vector.shape_cast %6 : vector<32xf32> to vector<32x1xf32>
    %cst_9 = arith.constant 3.200000e+01 : f32
    %8 = vector.broadcast %cst_9 : f32 to vector<32x1xf32>
    %9 = arith.divf %7, %8 : vector<32x1xf32>
    %10 = vector.broadcast %9 : vector<32x1xf32> to vector<32x32xf32>
    %11 = arith.subf %1, %10 : vector<32x32xf32>
    %12 = arith.mulf %11, %11 : vector<32x32xf32>
    %cst_10 = arith.constant dense<0.000000e+00> : vector<32xf32>
    %13 = vector.multi_reduction <add>, %12, %cst_10 [1] : vector<32x32xf32> to vector<32xf32>
    %14 = vector.shape_cast %13 : vector<32xf32> to vector<32x1xf32>
    %cst_11 = arith.constant 3.200000e+01 : f32
    %15 = vector.broadcast %cst_11 : f32 to vector<32x1xf32>
    %16 = arith.divf %14, %15 : vector<32x1xf32>
    %17 = vector.broadcast %9 : vector<32x1xf32> to vector<32x32xf32>
    %18 = arith.subf %1, %17 : vector<32x32xf32>
    %cst_12 = arith.constant 9.99999974E-6 : f32
    %19 = vector.broadcast %cst_12 : f32 to vector<32x1xf32>
    %20 = arith.addf %16, %19 : vector<32x1xf32>
    %21 = math.rsqrt %20 : vector<32x1xf32>
    %22 = vector.broadcast %21 : vector<32x1xf32> to vector<32x32xf32>
    %23 = arith.mulf %18, %22 : vector<32x32xf32>
    %24 = vector.broadcast %4 : vector<1x32xf32> to vector<32x32xf32>
    %25 = arith.mulf %23, %24 : vector<32x32xf32>
    %26 = vector.broadcast %5 : vector<1x32xf32> to vector<32x32xf32>
    %27 = arith.addf %25, %26 : vector<32x32xf32>
    %c0_13 = arith.constant 0 : index
    %c0_14 = arith.constant 0 : index
    %28 = vector.load %arg5[%c0_13, %c0_14] : memref<1x32xf32, #tpu.memory_space<vmem>>, vector<1x32xf32>
    %c0_15 = arith.constant 0 : index
    %c0_16 = arith.constant 0 : index
    %29 = vector.load %arg6[%c0_15, %c0_16] : memref<1x32xf32, #tpu.memory_space<vmem>>, vector<1x32xf32>
    %cst_17 = arith.constant dense<0.000000e+00> : vector<16xf32>
    %30 = vector.multi_reduction <add>, %3, %cst_17 [1] : vector<16x32xf32> to vector<16xf32>
    %31 = vector.shape_cast %30 : vector<16xf32> to vector<16x1xf32>
    %cst_18 = arith.constant 3.200000e+01 : f32
    %32 = vector.broadcast %cst_18 : f32 to vector<16x1xf32>
    %33 = arith.divf %31, %32 : vector<16x1xf32>
    %34 = vector.broadcast %33 : vector<16x1xf32> to vector<16x32xf32>
    %35 = arith.subf %3, %34 : vector<16x32xf32>
    %36 = arith.mulf %35, %35 : vector<16x32xf32>
    %cst_19 = arith.constant dense<0.000000e+00> : vector<16xf32>
    %37 = vector.multi_reduction <add>, %36, %cst_19 [1] : vector<16x32xf32> to vector<16xf32>
    %38 = vector.shape_cast %37 : vector<16xf32> to vector<16x1xf32>
    %cst_20 = arith.constant 3.200000e+01 : f32
    %39 = vector.broadcast %cst_20 : f32 to vector<16x1xf32>
    %40 = arith.divf %38, %39 : vector<16x1xf32>
    %41 = vector.broadcast %33 : vector<16x1xf32> to vector<16x32xf32>
    %42 = arith.subf %3, %41 : vector<16x32xf32>
    %cst_21 = arith.constant 9.99999974E-6 : f32
    %43 = vector.broadcast %cst_21 : f32 to vector<16x1xf32>
    %44 = arith.addf %40, %43 : vector<16x1xf32>
    %45 = math.rsqrt %44 : vector<16x1xf32>
    %46 = vector.broadcast %45 : vector<16x1xf32> to vector<16x32xf32>
    %47 = arith.mulf %42, %46 : vector<16x32xf32>
    %48 = vector.broadcast %28 : vector<1x32xf32> to vector<16x32xf32>
    %49 = arith.mulf %47, %48 : vector<16x32xf32>
    %50 = vector.broadcast %29 : vector<1x32xf32> to vector<16x32xf32>
    %51 = arith.addf %49, %50 : vector<16x32xf32>
    %c0_22 = arith.constant 0 : index
    %c0_23 = arith.constant 0 : index
    %52 = vector.load %arg7[%c0_22, %c0_23] : memref<32x32xf32, #tpu.memory_space<vmem>>, vector<32x32xf32>
    %cst_24 = arith.constant dense<0.000000e+00> : vector<16x32xf32>
    %53 = tpu.matmul %51, %52, %cst_24 {dimension_numbers = #tpu.dot_dimension_numbers<[1], [0], [0], [1], [0, 0, 1, 1], [], []>} : vector<16x32xf32>, vector<32x32xf32>, vector<16x32xf32> -> vector<16x32xf32>
    %cst_25 = arith.constant 0.353553385 : f32
    %54 = vector.broadcast %cst_25 : f32 to vector<16x32xf32>
    %55 = arith.mulf %53, %54 : vector<16x32xf32>
    %56 = vector.shape_cast %27 : vector<32x32xf32> to vector<2x16x32xf32>
    %57 = vector.shape_cast %51 : vector<16x32xf32> to vector<2x8x32xf32>
    %58 = tpu.concatenate %56, %57 in 1 : vector<2x16x32xf32>, vector<2x8x32xf32> -> vector<2x24x32xf32>
    %59 = vector.shape_cast %58 : vector<2x24x32xf32> to vector<48x32xf32>
    %c0_26 = arith.constant 0 : index
    %c0_27 = arith.constant 0 : index
    %60 = vector.load %arg8[%c0_26, %c0_27] : memref<32x64xf32, #tpu.memory_space<vmem>>, vector<32x64xf32>
    %cst_28 = arith.constant dense<0.000000e+00> : vector<48x64xf32>
    %61 = tpu.matmul %59, %60, %cst_28 {dimension_numbers = #tpu.dot_dimension_numbers<[1], [0], [0], [1], [0, 0, 1, 1], [], []>} : vector<48x32xf32>, vector<32x64xf32>, vector<48x64xf32> -> vector<48x64xf32>
    %62 = vector.extract_strided_slice %61 {offsets = [0, 0], sizes = [48, 32], strides = [1, 1]} : vector<48x64xf32> to vector<48x32xf32>
    %63 = vector.extract_strided_slice %61 {offsets = [0, 32], sizes = [48, 32], strides = [1, 1]} : vector<48x64xf32> to vector<48x32xf32>
    %64 = vector.shape_cast %55 : vector<16x32xf32> to vector<2x8x4x8xf32>
    %65 = tpu.transpose %64, [0, 2, 1, 3] : vector<2x8x4x8xf32> -> vector<2x4x8x8xf32>
    %66 = vector.shape_cast %65 : vector<2x4x8x8xf32> to vector<8x8x8xf32>
    %67 = vector.shape_cast %62 : vector<48x32xf32> to vector<2x24x4x8xf32>
    %68 = tpu.transpose %67, [0, 2, 1, 3] : vector<2x24x4x8xf32> -> vector<2x4x24x8xf32>
    %69 = vector.shape_cast %68 : vector<2x4x24x8xf32> to vector<8x24x8xf32>
    %70 = vector.shape_cast %63 : vector<48x32xf32> to vector<2x24x4x8xf32>
    %71 = tpu.transpose %70, [0, 2, 1, 3] : vector<2x24x4x8xf32> -> vector<2x4x24x8xf32>
    %72 = vector.shape_cast %71 : vector<2x4x24x8xf32> to vector<8x24x8xf32>
    "tpu.trace_start"() <{level = 10 : i32, message = "bqd,bkd->bqk"}> : () -> ()
    %cst_29 = arith.constant dense<0.000000e+00> : vector<8x8x24xf32>
    %73 = tpu.matmul %66, %69, %cst_29 {dimension_numbers = #tpu.dot_dimension_numbers<[2], [2], [1], [1], [0, 0, 0, 1, 1, 1], [0], [0]>} : vector<8x8x8xf32>, vector<8x24x8xf32>, vector<8x8x24xf32> -> vector<8x8x24xf32>
    "tpu.trace_stop"() : () -> ()
    %cst_30 = arith.constant dense<0xFF800000> : vector<8x8xf32>
    %74 = vector.multi_reduction <maximumf>, %73, %cst_30 [2] : vector<8x8x24xf32> to vector<8x8xf32>
    %75 = vector.shape_cast %74 : vector<8x8xf32> to vector<8x8x1xf32>
    %76 = vector.broadcast %75 : vector<8x8x1xf32> to vector<8x8x24xf32>
    %77 = arith.subf %73, %76 : vector<8x8x24xf32>
    %78 = math.exp %77 : vector<8x8x24xf32>
    %cst_31 = arith.constant dense<0.000000e+00> : vector<8x8xf32>
    %79 = vector.multi_reduction <add>, %78, %cst_31 [2] : vector<8x8x24xf32> to vector<8x8xf32>
    %80 = vector.shape_cast %79 : vector<8x8xf32> to vector<8x8x1xf32>
    "tpu.trace_start"() <{level = 10 : i32, message = "bqk,bkd->bqd"}> : () -> ()
    %cst_32 = arith.constant dense<0.000000e+00> : vector<8x8x8xf32>
    %81 = tpu.matmul %78, %72, %cst_32 {dimension_numbers = #tpu.dot_dimension_numbers<[2], [1], [1], [2], [0, 0, 0, 1, 1, 2], [0], [0]>} : vector<8x8x24xf32>, vector<8x24x8xf32>, vector<8x8x8xf32> -> vector<8x8x8xf32>
    "tpu.trace_stop"() : () -> ()
    %82 = tpu.reciprocal %80 {approx = true} : vector<8x8x1xf32> -> vector<8x8x1xf32>
    %83 = vector.broadcast %82 : vector<8x8x1xf32> to vector<8x8x8xf32>
    %84 = arith.mulf %81, %83 : vector<8x8x8xf32>
    %85 = vector.shape_cast %84 : vector<8x8x8xf32> to vector<2x4x8x8xf32>
    %86 = tpu.transpose %85, [0, 2, 1, 3] : vector<2x4x8x8xf32> -> vector<2x8x4x8xf32>
    %87 = vector.shape_cast %86 : vector<2x8x4x8xf32> to vector<16x32xf32>
    %c0_33 = arith.constant 0 : index
    %c0_34 = arith.constant 0 : index
    %88 = vector.load %arg9[%c0_33, %c0_34] : memref<32x32xf32, #tpu.memory_space<vmem>>, vector<32x32xf32>
    %cst_35 = arith.constant dense<0.000000e+00> : vector<16x32xf32>
    %89 = tpu.matmul %87, %88, %cst_35 {dimension_numbers = #tpu.dot_dimension_numbers<[1], [0], [0], [1], [0, 0, 1, 1], [], []>} : vector<16x32xf32>, vector<32x32xf32>, vector<16x32xf32> -> vector<16x32xf32>
    %90 = vector.shape_cast %89 : vector<16x32xf32> to vector<2x8x32xf32>
    %c0_36 = arith.constant 0 : index
    %c0_37 = arith.constant 0 : index
    %c0_38 = arith.constant 0 : index
    %91 = vector.load %arg10[%c0_36, %c0_37, %c0_38] : memref<2x8x32xf32, #tpu.memory_space<vmem>>, vector<2x8x32xf32>
    tpu.vector_store %arg10[%c0_36, %c0_37, %c0_38], %90 {strides = array<i32>} : memref<2x8x32xf32, #tpu.memory_space<vmem>>, vector<2x8x32xf32>,
    return
  }
  func.func @transform_0(%arg0: i32) -> (i32, i32, i32) {
    %c0_i32 = arith.constant 0 : i32
    %c0_i32_0 = arith.constant 0 : i32
    %c0_i32_1 = arith.constant 0 : i32
    return %arg0, %c0_i32, %c0_i32_0 : i32, i32, i32
  }
  func.func @transform_1(%arg0: i32) -> (i32, i32, i32) {
    %c0_i32 = arith.constant 0 : i32
    %c0_i32_0 = arith.constant 0 : i32
    %c0_i32_1 = arith.constant 0 : i32
    return %arg0, %c0_i32, %c0_i32_0 : i32, i32, i32
  }
  func.func @transform_2(%arg0: i32) -> (i32, i32) {
    %c0_i32 = arith.constant 0 : i32
    %c0_i32_0 = arith.constant 0 : i32
    %c0_i32_1 = arith.constant 0 : i32
    return %c0_i32, %c0_i32_0 : i32, i32
  }
  func.func @transform_3(%arg0: i32) -> (i32, i32) {
    %c0_i32 = arith.constant 0 : i32
    %c0_i32_0 = arith.constant 0 : i32
    %c0_i32_1 = arith.constant 0 : i32
    return %c0_i32, %c0_i32_0 : i32, i32
  }
  func.func @transform_4(%arg0: i32) -> (i32, i32) {
    %c0_i32 = arith.constant 0 : i32
    %c0_i32_0 = arith.constant 0 : i32
    %c0_i32_1 = arith.constant 0 : i32
    return %c0_i32, %c0_i32_0 : i32, i32
  }
  func.func @transform_5(%arg0: i32) -> (i32, i32) {
    %c0_i32 = arith.constant 0 : i32
    %c0_i32_0 = arith.constant 0 : i32
    %c0_i32_1 = arith.constant 0 : i32
    return %c0_i32, %c0_i32_0 : i32, i32
  }
  func.func @transform_6(%arg0: i32) -> (i32, i32) {
    %c0_i32 = arith.constant 0 : i32
    %c0_i32_0 = arith.constant 0 : i32
    %c0_i32_1 = arith.constant 0 : i32
    return %c0_i32, %c0_i32_0 : i32, i32
  }
  func.func @transform_7(%arg0: i32) -> (i32, i32) {
    %c0_i32 = arith.constant 0 : i32
    %c0_i32_0 = arith.constant 0 : i32
    %c0_i32_1 = arith.constant 0 : i32
    return %c0_i32, %c0_i32_0 : i32, i32
  }
  func.func @transform_8(%arg0: i32) -> (i32, i32) {
    %c0_i32 = arith.constant 0 : i32
    %c0_i32_0 = arith.constant 0 : i32
    %c0_i32_1 = arith.constant 0 : i32
    return %c0_i32, %c0_i32_0 : i32, i32
  }
  func.func @transform_9(%arg0: i32) -> (i32, i32, i32) {
    %c0_i32 = arith.constant 0 : i32
    %c0_i32_0 = arith.constant 0 : i32
    %c0_i32_1 = arith.constant 0 : i32
    return %arg0, %c0_i32, %c0_i32_0 : i32, i32, i32
  }
}

</mosaic_0001>

<bundles_post_ra>
// kernel: tpu_custom_call.1
= control target key start
LH: loop header
LB: loop body
LE: loop exit
PB: predicated region body
PF: predicated region fallthrough
CT: control target
= control target key end

     0   :  { %s5485_s0 = inlined_call_operand.hbm [shape: f32[4,16,32], index: 0, kind: input, shape index: {}]   ;;  %s5486_s1 = inlined_call_operand.hbm [shape: f32[4,8,32], index: 1, kind: input, shape index: {}]   ;;  %s5487_s2 = inlined_call_operand.vmem [shape: f32[1,32], index: 2, kind: input, shape index: {}]   ;;  %s5488_s3 = inlined_call_operand.vmem [shape: f32[1,32], index: 3, kind: input, shape index: {}]   ;;  %s5489_s4 = inlined_call_operand.vmem [shape: f32[1,32], index: 4, kind: input, shape index: {}]   ;;  %s5490_s5 = inlined_call_operand.vmem [shape: f32[1,32], index: 5, kind: input, shape index: {}]   ;;  %s5491_s6 = inlined_call_operand.hbm [shape: f32[32,32], index: 6, kind: input, shape index: {}]   ;;  %s5492_s7 = inlined_call_operand.hbm [shape: f32[32,64], index: 7, kind: input, shape index: {}]   ;;  %s5493_s8 = inlined_call_operand.hbm [shape: f32[32,32], index: 8, kind: input, shape index: {}]   ;;  %s5494_s9 = inlined_call_operand.hbm [shape: f32[4,8,32], index: 9, kind: output, shape index: {}]  }
   0x1   :  { %5504 = sst [smem:[#allocation22_spill]] %s5491_s6 }
   0x2   :  { %5505 = sst [smem:[#allocation23_spill]] %s5492_s7 }
   0x3   :  { %5506 = sst [smem:[#allocation24_spill]] %s5493_s8 }
   0x4   :  { %14 = vsyncpa [#allocation3], 0 }
   0x5   :  { %16 = vsyncpa [#allocation3 + $0x1], 0 }
   0x6   :  { %17 = vsyncpa [#allocation6], 0 }
   0x7   :  { %19 = vsyncpa [#allocation6 + $0x1], 0 }
   0x8   :  { %20 = vsyncpa [#allocation9], 0 }
   0x9   :  { %21 = vsyncpa [#allocation4], 0 }
   0xa   :  { %23 = vsyncpa [#allocation4 + $0x1], 0  ;;  %s3937_s30 = smov 0   ;;  %s3939_s10 = smov 0  }
   0xb   :  { %s3941_s11 = smov 0   ;;  %s3943_s12 = smov 0  }
   0xc LB: > { %5507 = sst [smem:[#allocation17_spill]] %s3857_s30  ;;  %s3958_s13 = sadd.s32 4294967295, %s3869_s12   ;;  %s3869_s12 = sphi %s3943_s12, %s5550_s12   ;;  %s3865_s11 = sphi %s3941_s11, %s5552_s11   ;;  %s3861_s10 = sphi %s3939_s10, %s5554_s10   ;;  %s3857_s30 = sphi %s3937_s30, %s5553_s30  }
   0xd   : > { %5508 = sst [smem:[#allocation18_spill]] %s3865_s11  ;;  %s3357_s14 = sadd.s32 4294967294, %s3869_s12  }
   0xe   : > { %p49_p0 = scmp.ne.s32.totalorder %s3861_s10, %s3857_s30  ;;  %p50_p1 = scmp.eq.s32.totalorder %s3958_s13, 0 }
   0xf   : > { %p246_p2 = scmp.eq.s32.totalorder %s3958_s13, 1  ;;  %p252_p3 = scmp.eq.s32.totalorder %s3357_s14, 1 }
  0x10   : > { %p3967_p4 = por %p50_p1, %p49_p0  ;;  %p3358_p5 = scmp.ge.s32.totalorder %s3869_s12, 1 }
  0x11   : > { %p3972_p6 = por %p252_p3, %p49_p0  ;;  %p259_p7 = scmp.lt.s32.totalorder %s3869_s12, 3 }
  0x12   : > { %s5512_s6 = sld [smem:[#allocation22_spill]]  ;;  %s3871_s21 = smov [#allocation7]  }
  0x13   : > { %s5510_s16 = scalar_select %p3972_p6, 1, 0 }
  0x14   : > { %p3980_p8 = pnand %p3358_p5, %p259_p7  ;;  %s284_s22 = sshll.u32 %s3871_s21, 4  ;;  %s285_s22 = int_to_ptr.vmem [resolvable:$true] %s284_s22 }
  0x15   : > { %5511 = sst [smem:[#allocation19_spill]] %s5510_s16  ;;  %s5495_s27 = smov 128  }
  0x16   : > { %p3454_p9 = pneg %p3980_p8  ;;  %s5515_s7 = sld [smem:[#allocation23_spill]] }
  0x17   : > { %s5497_s28 = smov 8   ;;  %s3874_s29 = smov [#allocation8]  }
  0x18   : > { %s282_s19 = sshll.u32 %s5512_s6, 4  ;;  %p3988_p10 = pnand %p3454_p9, %p50_p1  ;;  %s283_s19 = int_to_ptr.hbm [resolvable:$true] %s282_s19 }
  0x19   : > { %s298_s14 = sshll.u32 %s3874_s29, 4  ;;  %s5516_s8 = sld [smem:[#allocation24_spill]]  ;;  %s299_s14 = int_to_ptr.vmem [resolvable:$true] %s298_s14 }
  0x1a   : > { %3457 = dma.hbm_to_vmem [thread:$0]  (!%p3988_p10), %s283_s19, 512, %s285_s22, [#allocation6], %s5495_s27, %s5495_s27, %s5497_s28  }
  0x1b   : > { %s3875_s19 = smov [#allocation10]   ;;  %s4010_s24 = sadd.s32 1, %s3869_s12  }
  0x1c   : > { %s296_s26 = sshll.u32 %s5515_s7, 4  ;;  %s312_s22 = sshll.u32 %s3875_s19, 4  ;;  %s297_s26 = int_to_ptr.hbm [resolvable:$true] %s296_s26  ;;  %s313_s22 = int_to_ptr.vmem [resolvable:$true] %s312_s22 }
  0x1d   : > { %3460 = dma.hbm_to_vmem [thread:$0]  (!%p3988_p10), %s297_s26, 512, %s299_s14, [#allocation9], %s5495_s27, %s5495_s27, %s5497_s28  }
  0x1e   : > { %5517 = sst [smem:[#allocation20_spill]] %s4010_s24  ;;  %s33_s25 = ssub.s32 %s3869_s12, %s4010_s24 }
  0x1f   : > { %s310_s21 = sshll.u32 %s5516_s8, 4  ;;  %s36_s29 = sadd.s32 1, %s3865_s11  ;;  %s311_s21 = int_to_ptr.hbm [resolvable:$true] %s310_s21 }
  0x20   : > { %3463 = dma.hbm_to_vmem [thread:$0]  (!%p3988_p10), %s311_s21, 512, %s313_s22, [#allocation9], %s5495_s27, %s5495_s27, %s5497_s28  }
  0x21   : > { %p34_p12 = scmp.eq.s32.totalorder %s33_s25, 0  ;;  %p43_p13 = scmp.ne.s32.totalorder %s3865_s11, %s3861_s10 }
  0x22   : > { %p44_p0 = scmp.eq.s32.totalorder %s3869_s12, 0  ;;  %p3478_p3 = scmp.lt.s32.totalorder %s3869_s12, 2 }
  0x23   : > { %s4025_s26 = scalar_select %p34_p12, %s3865_s11, %s36_s29  }
  0x24   : > { %p45_p5 = por %p44_p0, %p43_p13  ;;  %p4029_p7 = por %p246_p2, %p43_p13 }
  0x25   : > { %5518 = sst [smem:[#allocation21_spill]] %s4025_s26  ;;  %s4034_s23 = sand.u32 1, %s3865_s11  }
  0x26   : > { %s3433_s17 = sshll.u32 %s3869_s12, 5  ;;  %s3363_s18 = sshll.u32 %s4034_s23, 5 }
  0x27   : > { %s336_s22 = scalar_lea.hbm %s5485_s0, %s3433_s17  ;;  %s330_s29 = scalar_lea.vmem [#allocation2], %s3363_s18 }
  0x28   : > { %s337_s25 = sshll.u32 %s336_s22, 4  ;;  %s339_s27 = sshll.u32 %s330_s29, 4  ;;  %s338_s25 = int_to_ptr.hbm [resolvable:$true] %s337_s25  ;;  %s340_s27 = int_to_ptr.vmem [resolvable:$true] %s339_s27 }
  0x29   : > { %p4043_p2 = pnand %p3478_p3, %p45_p5  ;;  %s349_s6 = sand.u32 1, %s3869_s12  }
  0x2a   : > { %s3367_s7 = sshll.u32 %s4034_s23, 4  ;;  %s327_s8 = scalar_lea.sflag [#allocation3], %s4034_s23 }
  0x2b   : > { %s3731_s26 = sshra.s32 %s338_s25, 4  ;;  %p3735_p10 = pneg %p4043_p2  ;;  %s3732_s26 = int_to_ptr.hbm [resolvable:$true] %s3731_s26 }
  0x2c   : > { %s3733_s11 = scalar_lea.hbm %s3732_s26, 32  ;;  %s3738_s21 = scalar_lea.hbm %s5485_s0, 64 }
  0x2d   : > { %p3734_p9 = scmp.ne.s32.totalorder %s3732_s26, %s3733_s11  ;;  %p3739_p0 = scmp.lt.s32.totalorder %s3732_s26, %s5485_s0 }
  0x2e   : > { %p3740_p3 = scmp.lt.s32.totalorder %s3738_s21, %s3733_s11 }
  0x2f   : > { %p3736_p12 = pnand %p3735_p10, %p3734_p9 }
  0x30   : > { %p3741_p5 = por %p3740_p3, %p3739_p0 }
  0x31   : > { %p3737_p13 = pneg %p3736_p12 }
  0x33   : > { %p3742_p11 = pnand %p3741_p5, %p3737_p13 }
  0x35   : > { %3745 = shalt.err (!%p3742_p11)
}
  0x36   : > { %s5521_s23 = smov 8   ;;  %s5522_s29 = smov 128  }
  0x37   : > { %3467 = dma.hbm_to_vmem [thread:$0]  (!%p4043_p2), %s338_s25, 512, %s340_s27, %s327_s8, %s5522_s29, %s5522_s29, %s5521_s23  }
  0x38   : > { %s3434_s24 = sshll.u32 %s3869_s12, 4  ;;  %s353_s16 = scalar_lea.vmem [#allocation5], %s3367_s7 }
  0x39   : > { %s361_s17 = sshll.u32 %s353_s16, 4  ;;  %s358_s19 = scalar_lea.hbm %s5486_s1, %s3434_s24  ;;  %s362_s17 = int_to_ptr.vmem [resolvable:$true] %s361_s17 }
  0x3a   : > { %s359_s11 = sshll.u32 %s358_s19, 4  ;;  %s350_s26 = scalar_lea.sflag [#allocation6], %s349_s6  ;;  %s360_s11 = int_to_ptr.hbm [resolvable:$true] %s359_s11 }
  0x3b   : > { %s3761_s21 = sshra.s32 %s360_s11, 4  ;;  %s3768_s7 = scalar_lea.hbm %s5486_s1, 32  ;;  %s3762_s21 = int_to_ptr.hbm [resolvable:$true] %s3761_s21 }
  0x3c   : > { %s3763_s22 = scalar_lea.hbm %s3762_s21, 16  ;;  %p3769_p13 = scmp.lt.s32.totalorder %s3762_s21, %s5486_s1 }
  0x3d   : > { %p3764_p11 = scmp.ne.s32.totalorder %s3762_s21, %s3763_s22  ;;  %p3770_p0 = scmp.lt.s32.totalorder %s3768_s7, %s3763_s22 }
  0x3f   : > { %p3766_p9 = pnand %p3764_p11, %p3735_p10  ;;  %p3771_p3 = por %p3770_p0, %p3769_p13 }
  0x41   : > { %p3767_p12 = pneg %p3766_p9 }
  0x43   : > { %p3772_p5 = pnand %p3771_p3, %p3767_p12 }
  0x45   : > { %3775 = shalt.err (!%p3772_p5)
}
  0x46   : > { %3470 = dma.hbm_to_vmem [thread:$0]  (!%p4043_p2), %s360_s11, 256, %s362_s17, %s350_s26, %s5522_s29, %s5522_s29, %s5521_s23  }
  0x47   : > { %373 = sbr.rel (%p3980_p8) target bundleno = 1400 (0x578), region = 56  ;;  %s4087_s6 = sand.u32 (!%p3980_p8), 1, %s3861_s10  }
  0x48   : > { %s3371_s30 = sshll.u32 (!%p3980_p8), %s4087_s6, 5  ;;  %s376_s24 = scalar_lea.sflag (!%p3980_p8), [#allocation3], %s4087_s6 }
  0x49   : > { %s379_s18 = scalar_lea.vmem (!%p3980_p8), [#allocation2], %s3371_s30 }
  0x4c   : > { %3836 = dma.done.wait (%p3967_p4), %s376_s24, 512  }
  0x4d   : > { %3838 = vsyncadd (%p3967_p4), %s376_s24, 4294966784  ;;  %s385_s20 = sand.u32 1, %s3958_s13   ;;  %s3372_s28 = sshll.u32 %s4087_s6, 4 }
  0x4e   : > { %s386_s23 = scalar_lea.sflag [#allocation6], %s385_s20  ;;  %s389_s29 = scalar_lea.vmem [#allocation5], %s3372_s28 }
  0x4f   : > { %3840 = dma.done.wait (%p3967_p4), %s386_s23, 256  }
  0x50   : > { %3842 = vsyncadd (%p3967_p4), %s386_s23, 4294967040 }
  0x51   : > { %3844 = dma.done.wait (%p50_p1), [#allocation6], 512  }
  0x52   : > { %3846 = vsyncadd (%p50_p1), [#allocation6], 4294966784 }
  0x53   : > { %3848 = dma.done.wait (%p50_p1), [#allocation9], 1024  }
  0x54   : > { %3850 = vsyncadd (%p50_p1), [#allocation9], 4294966272  ;;  %vm456_vm0 = vcmask 261120   ;;  %v452_v0 = vld [vmem:[%s389_s29] sm:$0xff]  ;;  %v451_v1 = vld [vmem:[%s379_s18 + $0x18] sm:$0xff]  ;;  %v3876_v12 = vmov 32.0  }
  0x55   : > { %v448_v2 = vld [vmem:[%s379_s18] sm:$0xff]  ;;  %v568_v3 = vsel %vm456_vm0, %v452_v0, 0.0  ;;  %v466_v4 = vsel %vm456_vm0, %v451_v1, 0.0  ;;  %v453_v6 = vld [vmem:[%s389_s29 + $0x8] sm:$0xff]  ;;  %v450_v7 = vld [vmem:[%s379_s18 + $0x10] sm:$0xff]  ;;  %3595 = vrcp.f32 %v3876_v12  ;;  %s3877_s27 = smov 104  }
  0x56   : > { %v457_v5 = vsel %vm456_vm0, %v448_v2, 0.0  ;;  %569 = vadd.xlane.f32.xlu1 %v568_v3  ;;  %467 = vadd.xlane.f32.xlu2 %v466_v4  ;;  %v449_v8 = vld [vmem:[%s379_s18 + $0x8] sm:$0xff]  ;;  %v571_v9 = vsel %vm456_vm0, %v453_v6, 0.0  ;;  %v463_v10 = vsel %vm456_vm0, %v450_v7, 0.0  ;;  %v625_v49 = vld [vmem:[#allocation7 + $0x18] sm:$0xff]  ;;  %v624_v51 = vld [vmem:[#allocation7 + $0x10] sm:$0xff] }
  0x57   : > { %458 = vadd.xlane.f32.xlu0 %v457_v5  ;;  %v460_v11 = vsel %vm456_vm0, %v449_v8, 0.0  ;;  %v660_v50 = vld [vmem:[#allocation8 + $0x18] sm:$0xff]  ;;  %644 = vmatpush.msra.mxu0 %v625_v49  ;;  %v659_v52 = vld [vmem:[#allocation8 + $0x10] sm:$0xff]  ;;  %v623_v53 = vld [vmem:[#allocation7 + $0x8] sm:$0xff]  ;;  %s3878_s7 = smov 112   ;;  %s3879_s16 = smov 120  }
  0x58   : > { %685 = vmatpush.msra.mxu1 %v660_v50  ;;  %v658_v54 = vld [vmem:[#allocation8 + $0x8] sm:$0xff]  ;;  %v622_v55 = vld [vmem:[#allocation7] sm:$0xff]  ;;  %s3880_s25 = smov 96   ;;  %s3883_s30 = smov 16  }
  0x59   : > { %645 = vmatpush.msra.mxu0 %v624_v51  ;;  %v657_v56 = vld [vmem:[#allocation8] sm:$0xff]  ;;  %s3884_s24 = smov 24   ;;  %s3885_s18 = smov 8  }
  0x5a   : > { %686 = vmatpush.msra.mxu1 %v659_v52  ;;  %s444_s20 = scalar_lea.vmem [#allocation11], %s3372_s28  ;;  %s3435_s23 = sshll.u32 %s3958_s13, 4 }
  0x5b   : > { %v3596_v13 = vpop.eup %3595  ;;  %646 = vmatpush.msra.mxu0 %v623_v53  ;;  %s3229_s17 = scalar_lea.hbm %s5494_s9, %s3435_s23  ;;  %s3230_s19 = sshll.u32 %s444_s20, 4  ;;  %s3231_s19 = int_to_ptr.vmem [resolvable:$true] %s3230_s19 }
  0x5c   : > { %v470_v14 = vmul.f32 32.0, %v3596_v13  ;;  %vm474_vm1 = vweird.f32 %v3596_v13  ;;  %687 = vmatpush.msra.mxu1 %v658_v54  ;;  %s3232_s11 = sshll.u32 %s3229_s17, 4  ;;  %s3218_s26 = scalar_lea.sflag [#allocation4], %s4087_s6  ;;  %s3233_s11 = int_to_ptr.hbm [resolvable:$true] %s3232_s11 }
  0x5d   : > { %647 = vmatpush.msra.mxu0 %v622_v55  ;;  %s3805_s21 = sshra.s32 %s3233_s11, 4  ;;  %s3811_s8 = scalar_lea.hbm %s5494_s9, 32  ;;  %s3806_s21 = int_to_ptr.hbm [resolvable:$true] %s3805_s21 }
  0x5e   : > { %572 = vadd.xlane.f32.xlu2 %v571_v9  ;;  %464 = vadd.xlane.f32.xlu1 %v463_v10  ;;  %v471_v15 = vsub.f32 1.0, %v470_v14  ;;  %s3807_s22 = scalar_lea.hbm %s3806_s21, 16  ;;  %p3812_p2 = scmp.lt.s32.totalorder %s3806_s21, %s5494_s9 }
  0x5f   : > { %461 = vadd.xlane.f32.xlu0 %v460_v11  ;;  %688 = vmatpush.msra.mxu1 %v657_v56  ;;  %p3808_p1 = scmp.ne.s32.totalorder %s3806_s21, %s3807_s22  ;;  %p3813_p10 = scmp.lt.s32.totalorder %s3811_s8, %s3807_s22 }
  0x60   : > { %v472_v16 = vmul.f32 %v3596_v13, %v471_v15 }
  0x61   : > { %p3809_p4 = pnand %p3808_p1, %p4029_p7  ;;  %p3814_p11 = por %p3813_p10, %p3812_p2 }
  0x62   : > { %v473_v17 = vadd.f32 %v3596_v13, %v472_v16 }
  0x63   : > { %p3810_p8 = pneg %p3809_p4 }
  0x64   : > { %v4117_v18 = vsel %vm474_vm1, %v3596_v13, %v473_v17 }
  0x65   : > { %p3815_p9 = pnand %p3814_p11, %p3810_p8 }
  0xc9   : > { %v570_v19 = vpop.xlane.xlu1 %569  ;;  %v468_v20 = vpop.xlane.xlu2 %467 }
  0xca   : > { %v574_v21 = vmul.f32 %v570_v19, %v4117_v18  ;;  %v459_v22 = vpop.xlane.xlu0 %458  ;;  %v479_v35 = vmul.f32 %v4117_v18, %v468_v20 }
  0xcb   : > { %v476_v23 = vmul.f32 %v4117_v18, %v459_v22 }
  0xcc   : > { %v4121_v24 = vsub.f32 %v452_v0, %v574_v21  ;;  %v4145_v42 = vsub.f32 %v451_v1, %v479_v35  ;;  %v3593_v35 = vld [vmem:[%s5487_s2] ss:$0 sm:$0xff] }
  0xcd   : > { %v4123_v25 = vsub.f32 %v448_v2, %v476_v23 }
  0xce   : > { %v578_v26 = vmul.f32 %v4121_v24, %v4121_v24  ;;  %v487_v47 = vmul.f32 %v4145_v42, %v4145_v42 }
  0xcf   : > { %v484_v27 = vmul.f32 %v4123_v25, %v4123_v25 }
  0xd0   : > { %v580_v28 = vsel %vm456_vm0, %v578_v26, 0.0  ;;  %v497_v48 = vsel %vm456_vm0, %v487_v47, 0.0 }
  0xd1   : > { %581 = vadd.xlane.f32.xlu2 %v580_v28  ;;  %v573_v29 = vpop.xlane.xlu2 %572  ;;  %v465_v30 = vpop.xlane.xlu1 %464  ;;  %v488_v31 = vsel %vm456_vm0, %v484_v27, 0.0 }
  0xd2   : > { %v575_v32 = vmul.f32 %v573_v29, %v4117_v18  ;;  %v478_v33 = vmul.f32 %v4117_v18, %v465_v30  ;;  %489 = vadd.xlane.f32.xlu0 %v488_v31  ;;  %v462_v34 = vpop.xlane.xlu0 %461 }
  0xd3   : > { %v477_v36 = vmul.f32 %v4117_v18, %v462_v34  ;;  %v3591_v34 = vld [vmem:[%s5489_s4] ss:$0 sm:$0xff] }
  0xd4   : > { %v4135_v37 = vsub.f32 %v453_v6, %v575_v32  ;;  %v4137_v38 = vsub.f32 %v450_v7, %v478_v33 }
  0xd5   : > { %v4139_v39 = vsub.f32 %v449_v8, %v477_v36 }
  0xd6   : > { %v579_v40 = vmul.f32 %v4135_v37, %v4135_v37  ;;  %v486_v41 = vmul.f32 %v4137_v38, %v4137_v38 }
  0xd7   : > { %v485_v43 = vmul.f32 %v4139_v39, %v4139_v39 }
  0xd8   : > { %v583_v44 = vsel %vm456_vm0, %v579_v40, 0.0  ;;  %v494_v45 = vsel %vm456_vm0, %v486_v41, 0.0 }
  0xd9   : > { %584 = vadd.xlane.f32.xlu2 %v583_v44  ;;  %v491_v46 = vsel %vm456_vm0, %v485_v43, 0.0  ;;  %v3592_v44 = vld [vmem:[%s5490_s5] ss:$0 sm:$0xff] }
  0xda   : > { %495 = vadd.xlane.f32.xlu0 %v494_v45  ;;  %492 = vadd.xlane.f32.xlu1 %v491_v46  ;;  %v3594_v46 = vld [vmem:[%s5488_s3] ss:$0 sm:$0xff] }
  0xe2   : > { %498 = vadd.xlane.f32.xlu1 %v497_v48 }
 0x144   : > { %v582_v57 = vpop.xlane.xlu2 %581 }
 0x145   : > { %v586_v58 = vmul.f32 %v582_v57, %v4117_v18  ;;  %v490_v59 = vpop.xlane.xlu0 %489 }
 0x146   : > { %v500_v60 = vmul.f32 %v490_v59, %v4117_v18 }
 0x147   : > { %v588_v61 = vadd.f32 1e-05, %v586_v58 }
 0x148   : > { %v504_v62 = vadd.f32 1e-05, %v500_v60 }
 0x149   : > { %3597 = vrsqrt.f32 %v588_v61  ;;  %vm596_vm4 = vweird.f32 %v588_v61 }
 0x14a   : > { %3599 = vrsqrt.f32 %v504_v62  ;;  %vm514_vm6 = vweird.f32 %v504_v62 }
 0x14c   : > { %v585_v63 = vpop.xlane.xlu2 %584 }
 0x14d   : > { %v587_v0 = vmul.f32 %v585_v63, %v4117_v18  ;;  %v493_v1 = vpop.xlane.xlu1 %492  ;;  %v496_v2 = vpop.xlane.xlu0 %495 }
 0x14e   : > { %v501_v3 = vmul.f32 %v493_v1, %v4117_v18  ;;  %v502_v4 = vmul.f32 %v496_v2, %v4117_v18 }
 0x14f   : > { %v3598_v5 = vpop.eup %3597  ;;  %v589_v6 = vadd.f32 1e-05, %v587_v0 }
 0x150   : > { %v3600_v7 = vpop.eup %3599  ;;  %v591_v8 = vmul.f32 %v3598_v5, %v588_v61  ;;  %v505_v9 = vadd.f32 1e-05, %v501_v3  ;;  %v4160_v10 = vadd.f32 1e-05, %v502_v4  ;;  %vm597_vm2 = vweird.f32 %v3598_v5 }
 0x151   : > { %v509_v11 = vmul.f32 %v3600_v7, %v504_v62  ;;  %3601 = vrsqrt.f32 %v589_v6  ;;  %vm515_vm3 = vweird.f32 %v3600_v7  ;;  %vm4166_vm5 = vmor %vm596_vm4, %vm597_vm2  ;;  %vm606_vm8 = vweird.f32 %v589_v6 }
 0x152   : > { %v592_v12 = vmul.f32 %v3598_v5, %v591_v8  ;;  %3603 = vrsqrt.f32 %v505_v9  ;;  %vm516_vm7 = vmor %vm514_vm6, %vm515_vm3  ;;  %vm524_vm12 = vweird.f32 %v505_v9  ;;  %vm534_vm14 = vweird.f32 %v4160_v10 }
 0x153   : > { %v510_v13 = vmul.f32 %v3600_v7, %v509_v11  ;;  %3605 = vrsqrt.f32 %v4160_v10  ;;  %vm2401_vm6 = vcmask 64512  }
 0x154   : > { %v593_v14 = vmul.f32 0.5, %v592_v12 }
 0x155   : > { %v511_v15 = vmul.f32 0.5, %v510_v13  ;;  %v499_v16 = vpop.xlane.xlu1 %498 }
 0x156   : > { %v594_v17 = vsub.f32 1.5, %v593_v14  ;;  %v503_v19 = vmul.f32 %v499_v16, %v4117_v18 }
 0x157   : > { %v3602_v20 = vpop.eup %3601  ;;  %v512_v21 = vsub.f32 1.5, %v511_v15 }
 0x158   : > { %v3604_v22 = vpop.eup %3603  ;;  %v595_v23 = vmul.f32 %v3598_v5, %v594_v17  ;;  %v601_v26 = vmul.f32 %v3602_v20, %v589_v6  ;;  %v4164_v27 = vadd.f32 1e-05, %v503_v19  ;;  %vm607_vm9 = vweird.f32 %v3602_v20 }
 0x159   : > { %v3606_v28 = vpop.eup %3605  ;;  %v513_v30 = vmul.f32 %v3600_v7, %v512_v21  ;;  %v519_v31 = vmul.f32 %v3604_v22, %v505_v9  ;;  %vm4188_vm10 = vmor %vm606_vm8, %vm607_vm9  ;;  %vm525_vm11 = vweird.f32 %v3604_v22  ;;  %vm3177_vm8 = vcmask 130048  }
 0x15a   : > { %v599_v18 = vsel %vm4166_vm5, %v3598_v5, %v595_v23  ;;  %v602_v32 = vmul.f32 %v3602_v20, %v601_v26  ;;  %v529_v33 = vmul.f32 %v3606_v28, %v4160_v10  ;;  %3607 = vrsqrt.f32 %v4164_v27  ;;  %vm526_vm13 = vmor %vm524_vm12, %vm525_vm11 }
 0x15b   : > { %v517_v36 = vsel %vm516_vm7, %v3600_v7, %v513_v30  ;;  %v520_v40 = vmul.f32 %v3604_v22, %v519_v31  ;;  %v610_v43 = vmul.f32 %v599_v18, %v4121_v24  ;;  %vm535_vm15 = vweird.f32 %v3606_v28 }
 0x15c   : > { %v603_v41 = vmul.f32 0.5, %v602_v32  ;;  %v548_v45 = vmul.f32 %v517_v36, %v4123_v25  ;;  %v530_v48 = vmul.f32 %v3606_v28, %v529_v33  ;;  %vm536_vm1 = vmor %vm534_vm14, %vm535_vm15  ;;  %vm544_vm2 = vweird.f32 %v4164_v27 }
 0x15d   : > { %v521_v47 = vmul.f32 0.5, %v520_v40  ;;  %v615_v50 = vmul.f32 %v3591_v34, %v610_v43  ;;  %v3881_v31 = vmov 1983009808   ;;  %vm729_vm5 = vcmask 1047556  }
 0x15e   : > { %v604_v49 = vsub.f32 1.5, %v603_v41  ;;  %v555_v51 = vmul.f32 %v3593_v35, %v548_v45  ;;  %v531_v57 = vmul.f32 0.5, %v530_v48  ;;  %v734_v18 = vunpack.c.l.s4 %v3881_v31 }
 0x15f   : > { %v522_v24 = vsub.f32 1.5, %v521_v47  ;;  %v620_v54 = vadd.f32 %v3592_v44, %v615_v50  ;;  %vm2658_vm7 = vcmask 195584  }
 0x160   : > { %v605_v53 = vmul.f32 %v3602_v20, %v604_v49  ;;  %v562_v55 = vadd.f32 %v3594_v46, %v555_v51  ;;  %v3608_v56 = vpop.eup %3607  ;;  %v532_v63 = vsub.f32 1.5, %v531_v57  ;;  %v4266_v41 = vunpack.c.0.s8 %v734_v18 }
 0x161   : > { %v523_v25 = vmul.f32 %v3604_v22, %v522_v24  ;;  %v539_v59 = vmul.f32 %v3608_v56, %v4164_v27  ;;  %3377 = vmatmul.msk.f32.vlgmr.msra.gmra.mxu0 %vm456_vm0, %v620_v54  ;;  %vm545_vm3 = vweird.f32 %v3608_v56 }
 0x162   : > { %v609_v58 = vsel %vm4188_vm10, %v3602_v20, %v605_v53  ;;  %3379 = vmatmul.msk.f32.vlgmr.msra.gmra.mxu1 %vm456_vm0, %v562_v55  ;;  %v533_v5 = vmul.f32 %v3606_v28, %v532_v63  ;;  %vm546_vm4 = vmor %vm544_vm2, %vm545_vm3 }
 0x163   : > { %v527_v60 = vsel %vm526_vm13, %v3604_v22, %v523_v25  ;;  %v611_v61 = vmul.f32 %v609_v58, %v4135_v37  ;;  %v540_v0 = vmul.f32 %v3608_v56, %v539_v59 }
 0x164   : > { %v549_v62 = vmul.f32 %v527_v60, %v4139_v39  ;;  %v537_v7 = vsel %vm536_vm1, %v3606_v28, %v533_v5 }
 0x165   : > { %v616_v1 = vmul.f32 %v3591_v34, %v611_v61  ;;  %v541_v6 = vmul.f32 0.5, %v540_v0  ;;  %v550_v39 = vmul.f32 %v537_v7, %v4137_v38 }
 0x166   : > { %v556_v2 = vmul.f32 %v3593_v35, %v549_v62 }
 0x167   : > { %v621_v3 = vadd.f32 %v3592_v44, %v616_v1  ;;  %v542_v37 = vsub.f32 1.5, %v541_v6  ;;  %v557_v9 = vmul.f32 %v3593_v35, %v550_v39  ;;  %v3882_v44 = vmov 1934713408  }
 0x168   : > { %v563_v4 = vadd.f32 %v3594_v46, %v556_v2  ;;  %v758_v45 = vunpack.c.l.s4 %v3882_v44 }
 0x169   : > { %3378 = vmatmul.msk.f32.gmra.mxu0 %vm456_vm0, %v621_v3  ;;  %v543_v8 = vmul.f32 %v3608_v56, %v542_v37  ;;  %v564_v11 = vadd.f32 %v3594_v46, %v557_v9 }
 0x16a   : > { %3380 = vmatmul.msk.f32.gmra.mxu1 %vm456_vm0, %v563_v4  ;;  %v4286_v58 = vunpack.c.0.s8 %v758_v45 }
 0x16b   : > { %v547_v10 = vsel %vm546_vm4, %v3608_v56, %v543_v8 }
 0x16c   : > { %v551_v12 = vmul.f32 %v547_v10, %v4145_v42 }
 0x16e   : > { %v558_v13 = vmul.f32 %v3593_v35, %v551_v12 }
 0x170   : > { %v565_v14 = vadd.f32 %v3594_v46, %v558_v13 }
 0x172   : > { %3381 = vmatmul.msk.f32.gmra.mxu1 %vm456_vm0, %v620_v54 }
 0x17a   : > { %3382 = vmatmul.msk.f32.gmra.mxu1 %vm456_vm0, %v564_v11 }
 0x182   : > { %3383 = vmatmul.msk.f32.gmra.mxu1 %vm456_vm0, %v565_v14 }
 0x18a   : > { %3384 = vmatmul.msk.f32.gmra.mxu1 %vm456_vm0, %v621_v3 }
 0x1de   : > { %v649_v15 = vpop.f32.mrf.mxu0 }
 0x1df   : > { %v4209_v16 = vpop.f32.mrf.mxu1  ;;  %v4211_v38 = vmul.f32 0.35355338, %v649_v15 }
 0x1e0   : > { %991 = vrot.lane.b32.xlu2 %v4209_v16, %s3877_s27  ;;  %973 = vrot.lane.b32.xlu0 %v4209_v16, %s3878_s7  ;;  %v1011_v36 = vrot.slane %v4209_v16, 4 }
 0x1e1   : > { %716 = vrot.lane.b32.xlu1 %v4211_v38, %s3878_s7  ;;  %v731_v47 = vrot.slane %v4211_v38, 4 }
 0x1e6   : > { %v652_v22 = vpop.f32.mrf.mxu0 }
 0x1e7   : > { %v4217_v42 = vpop.f32.mrf.mxu1  ;;  %v4251_v23 = vmul.f32 0.35355338, %v652_v22 }
 0x1e8   : > { %722 = vrot.lane.b32.xlu2 %v4211_v38, %s3877_s27  ;;  %955 = vrot.lane.b32.xlu0 %v4209_v16, %s3879_s16  ;;  %v1067_v49 = vrot.slane %v4217_v42, 4 }
 0x1e9   : > { %710 = vrot.lane.b32.xlu1 %v4211_v38, %s3879_s16  ;;  %v787_v52 = vrot.slane %v4251_v23, 4 }
 0x1ef   : > { %v4223_v17 = vpop.f32.mrf.mxu1 }
 0x1f0   : > { %993 = vrot.lane.b32.xlu2 %v4217_v42, %s3877_s27  ;;  %975 = vrot.lane.b32.xlu0 %v4217_v42, %s3878_s7  ;;  %v1123_v51 = vrot.slane %v4223_v17, 4 }
 0x1f1   : > { %957 = vrot.lane.b32.xlu1 %v4217_v42, %s3879_s16 }
 0x1f7   : > { %v4229_v19 = vpop.f32.mrf.mxu1 }
 0x1f8   : > { %959 = vrot.lane.b32.xlu2 %v4223_v17, %s3879_s16  ;;  %977 = vrot.lane.b32.xlu0 %v4223_v17, %s3878_s7  ;;  %v1179_v50 = vrot.slane %v4229_v19, 4 }
 0x1f9   : > { %995 = vrot.lane.b32.xlu1 %v4223_v17, %s3877_s27 }
 0x1ff   : > { %v4235_v20 = vpop.f32.mrf.mxu1 }
 0x200   : > { %981 = vrot.lane.b32.xlu2 %v4235_v20, %s3878_s7  ;;  %963 = vrot.lane.b32.xlu0 %v4235_v20, %s3879_s16  ;;  %v1235_v55 = vrot.slane %v4235_v20, 4 }
 0x201   : > { %999 = vrot.lane.b32.xlu1 %v4235_v20, %s3877_s27 }
 0x207   : > { %v4241_v21 = vpop.f32.mrf.mxu1 }
 0x208   : > { %983 = vrot.lane.b32.xlu2 %v4241_v21, %s3878_s7  ;;  %965 = vrot.lane.b32.xlu0 %v4241_v21, %s3879_s16  ;;  %v3531_v26 = vpack.i.bf16 %v4235_v20, %v4241_v21  ;;  %v1291_v60 = vrot.slane %v4241_v21, 4 }
 0x209   : > { %1001 = vrot.lane.b32.xlu1 %v4241_v21, %s3877_s27 }
 0x210   : > { %979 = vrot.lane.b32.xlu2 %v4229_v19, %s3878_s7  ;;  %961 = vrot.lane.b32.xlu0 %v4229_v19, %s3879_s16 }
 0x211   : > { %997 = vrot.lane.b32.xlu1 %v4229_v19, %s3877_s27 }
 0x218   : > { %718 = vrot.lane.b32.xlu2 %v4251_v23, %s3878_s7  ;;  %712 = vrot.lane.b32.xlu0 %v4251_v23, %s3879_s16 }
 0x219   : > { %724 = vrot.lane.b32.xlu1 %v4251_v23, %s3877_s27 }
 0x220   : > { %3532 = vrot.lane.b32.xlu0 %v3531_v26, %s3880_s25 }
 0x23a   : > { %v992_v27 = vpop.permute.xlu2 %991 }
 0x23b   : > { %v1021_v24 = vrot.slane %v992_v27, 4 }
 0x242   : > { %v723_v28 = vpop.permute.xlu2 %722 }
 0x243   : > { %v741_v61 = vrot.slane %v723_v28, 4 }
 0x24a   : > { %v4260_v29 = vpop.permute.xlu2 %993 }
 0x252   : > { %v4262_v30 = vpop.permute.xlu2 %959  ;;  %v974_v32 = vpop.permute.xlu0 %973 }
 0x253   : > { %v1009_v33 = vrot.slane %v974_v32, 4  ;;  %v3541_v34 = vpack.i.bf16 %v4260_v29, %v974_v32  ;;  %v717_v35 = vpop.permute.xlu1 %716  ;;  %v1012_v46 = vsel %vm729_vm5, %v974_v32, %v1011_v36  ;;  %v3561_v62 = vpack.i.bf16 %v4262_v30, %v4217_v42 }
 0x254   : > { %v728_v40 = vrot.slane %v717_v35, 4  ;;  %v732_v54 = vsel %vm729_vm5, %v717_v35, %v731_v47  ;;  %v1020_v56 = vperm.slane %v1012_v46, %v4266_v41 }
 0x255   : > { %v1010_v43 = vsel %vm729_vm5, %v1009_v33, %v4209_v16  ;;  %3542 = vrot.lane.b32.xlu0 %v3541_v34, %s3880_s25  ;;  %v740_v1 = vperm.slane %v732_v54, %v4266_v41 }
 0x256   : > { %v730_v48 = vsel %vm729_vm5, %v728_v40, %v4211_v38  ;;  %v1016_v53 = vperm.slane %v1010_v43, %v4266_v41  ;;  %v1047_v8 = vrot.slane %v1020_v56, 4 }
 0x257   : > { %v736_v25 = vperm.slane %v730_v48, %v4266_v41  ;;  %v767_v31 = vrot.slane %v740_v1, 4 }
 0x258   : > { %v1035_v6 = vrot.slane %v1016_v53, 4 }
 0x259   : > { %v755_v9 = vrot.slane %v736_v25, 4 }
 0x25a   : > { %v4284_v57 = vpop.permute.xlu2 %981  ;;  %v956_v59 = vpop.permute.xlu0 %955 }
 0x25b   : > { %v1022_v63 = vsel %vm729_vm5, %v1021_v24, %v956_v59  ;;  %v1023_v0 = vrot.slane %v956_v59, 4  ;;  %v1233_v2 = vrot.slane %v4284_v57, 4  ;;  %v3536_v4 = vpack.i.bf16 %v956_v59, %v992_v27  ;;  %v711_v5 = vpop.permute.xlu1 %710 }
 0x25c   : > { %v1028_v3 = vperm.slane %v1022_v63, %v4266_v41  ;;  %v742_v37 = vsel %vm729_vm5, %v741_v61, %v711_v5  ;;  %v743_v39 = vrot.slane %v711_v5, 4  ;;  %v1236_v12 = vsel %vm729_vm5, %v4284_v57, %v1235_v55 }
 0x25d   : > { %v1024_v7 = vsel %vm729_vm5, %v992_v27, %v1023_v0  ;;  %3537 = vrot.lane.b32.xlu1 %v3536_v4, %s3880_s25  ;;  %v748_v15 = vperm.slane %v742_v37, %v4266_v41  ;;  %v1234_v38 = vsel %vm729_vm5, %v1233_v2, %v4235_v20  ;;  %v4323_v44 = vperm.slane %v1236_v12, %v4266_v41 }
 0x25e   : > { %v1032_v10 = vperm.slane %v1024_v7, %v4266_v41  ;;  %v1033_v11 = vrot.slane %v1028_v3, 4  ;;  %v1036_v13 = vsel %vm729_vm5, %v1028_v3, %v1035_v6  ;;  %v744_v14 = vsel %vm729_vm5, %v723_v28, %v743_v39 }
 0x25f   : > { %v1044_v26 = vperm.slane %v1036_v13, %v4286_v58  ;;  %v752_v32 = vperm.slane %v744_v14, %v4266_v41  ;;  %v753_v33 = vrot.slane %v748_v15, 4  ;;  %v756_v36 = vsel %vm729_vm5, %v748_v15, %v755_v9 }
 0x260   : > { %v1034_v22 = vsel %vm729_vm5, %v1033_v11, %v1016_v53  ;;  %v1045_v27 = vrot.slane %v1032_v10, 4  ;;  %v1048_v18 = vsel %vm729_vm5, %v1032_v10, %v1047_v8  ;;  %v4320_v43 = vperm.slane %v1234_v38, %v4266_v41 }
 0x261   : > { %v1056_v28 = vperm.slane %v1048_v18, %v4286_v58  ;;  %v4312_v35 = vrot.slane %v1044_v26, 4  ;;  %v754_v45 = vsel %vm729_vm5, %v753_v33, %v736_v25  ;;  %v764_v46 = vperm.slane %v756_v36, %v4286_v58 }
 0x262   : > { %v1046_v34 = vsel %vm729_vm5, %v1045_v27, %v1020_v56  ;;  %v4315_v20 = vpop.permute.xlu2 %983  ;;  %v4317_v40 = vpop.permute.xlu0 %975  ;;  %v4328_v47 = vperm.slane %v1034_v22, %v4286_v58  ;;  %v760_v24 = vperm.slane %v754_v45, %v4286_v58  ;;  %v765_v53 = vrot.slane %v752_v32, 4 }
 0x263   : > { %v4330_v48 = vrot.slane %v1056_v28, 4  ;;  %v958_v54 = vpop.permute.xlu1 %957  ;;  %v1077_v55 = vrot.slane %v4260_v29, 4  ;;  %v4335_v56 = vperm.slane %v1046_v34, %v4286_v58  ;;  %v768_v59 = vsel %vm729_vm5, %v752_v32, %v767_v31 }
 0x264   : > { %v779_v61 = vrot.slane %v764_v46, 4  ;;  %v1135_v25 = vrot.slane %v4262_v30, 4  ;;  %v4341_v63 = vsel %vm729_vm5, 0.0, %v4312_v35  ;;  %v766_v0 = vsel %vm729_vm5, %v765_v53, %v740_v1 }
 0x265   : > { %v776_v2 = vperm.slane %v768_v59, %v4286_v58  ;;  %3562 = vrot.lane.b32.xlu1 %v3561_v62, %s3880_s25  ;;  %v4348_v3 = vsel %vm729_vm5, 0.0, %v4330_v48  ;;  %v4351_v4 = vperm.slane %v766_v0, %v4286_v58  ;;  %v777_v5 = vrot.slane %v760_v24, 4 }
 0x266   : > { %v841_v6 = vsel %vm729_vm5, %v779_v61, %v760_v24  ;;  %v1259_v7 = vrot.slane %v4320_v43, 4  ;;  %v1271_v37 = vrot.slane %v4323_v44, 4  ;;  %v1289_v9 = vrot.slane %v4315_v20, 4 }
 0x267   : > { %v783_v39 = vrot.slane %v776_v2, 4  ;;  %v1065_v10 = vrot.slane %v4317_v40, 4  ;;  %v4363_v12 = vsel %vm729_vm5, 0.0, %v779_v61  ;;  %v1068_v14 = vsel %vm729_vm5, %v4317_v40, %v1067_v49 }
 0x268   : > { %v4376_v22 = vsel %vm729_vm5, 0.0, %v777_v5  ;;  %v4379_v26 = vperm.slane %v841_v6, %v4266_v41  ;;  %v1076_v31 = vperm.slane %v1068_v14, %v4266_v41  ;;  %v1292_v49 = vsel %vm729_vm5, %v4315_v20, %v1291_v60 }
 0x269   : > { %v4367_v13 = vsel %vm729_vm5, %v783_v39, %v4351_v4  ;;  %v1066_v27 = vsel %vm729_vm5, %v1065_v10, %v4217_v42  ;;  %v4385_v18 = vsel %vm729_vm5, 0.0, %v783_v39  ;;  %v1079_v33 = vrot.slane %v958_v54, 4 }
 0x26a   : > { %v4373_v15 = vpop.permute.xlu2 %979  ;;  %v978_v38 = vpop.permute.xlu0 %977  ;;  %v1072_v32 = vperm.slane %v1066_v27, %v4266_v41  ;;  %v1290_v28 = vsel %vm729_vm5, %v1289_v9, %v4241_v21  ;;  %v3546_v42 = vpack.i.bf16 %v958_v54, %v4209_v16  ;;  %v1078_v36 = vsel %vm729_vm5, %v1077_v55, %v958_v54 }
 0x26b   : > { %v4392_v34 = vpop.permute.xlu1 %995  ;;  %v1177_v45 = vrot.slane %v4373_v15, 4  ;;  %v1103_v24 = vrot.slane %v1076_v31, 4  ;;  %v1080_v53 = vsel %vm729_vm5, %v4260_v29, %v1079_v33  ;;  %v1084_v60 = vperm.slane %v1078_v36, %v4266_v41 }
 0x26c   : > { %v1091_v46 = vrot.slane %v1072_v32, 4  ;;  %v1088_v59 = vperm.slane %v1080_v53, %v4266_v41  ;;  %3547 = vrot.lane.b32.xlu2 %v3546_v42, %s3880_s25  ;;  %v1180_v16 = vsel %vm729_vm5, %v4373_v15, %v1179_v50  ;;  %v1121_v54 = vrot.slane %v978_v38, 4 }
 0x26d   : > { %v1178_v21 = vsel %vm729_vm5, %v1177_v45, %v4229_v19  ;;  %v4411_v55 = vperm.slane %v1290_v28, %v4266_v41  ;;  %v4414_v29 = vperm.slane %v1292_v49, %v4266_v41  ;;  %v1089_v61 = vrot.slane %v1084_v60, 4 }
 0x26e   : > { %v1092_v0 = vsel %vm729_vm5, %v1084_v60, %v1091_v46  ;;  %v1104_v5 = vsel %vm729_vm5, %v1088_v59, %v1103_v24  ;;  %v4420_v6 = vperm.slane %v1178_v21, %v4266_v41  ;;  %v1122_v50 = vsel %vm729_vm5, %v1121_v54, %v4223_v17 }
 0x26f   : > { %v1100_v2 = vperm.slane %v1092_v0, %v4286_v58  ;;  %v1101_v10 = vrot.slane %v1088_v59, 4  ;;  %v4427_v14 = vperm.slane %v1180_v16, %v4266_v41  ;;  %v1090_v49 = vsel %vm729_vm5, %v1089_v61, %v1072_v32 }
 0x270   : > { %v1112_v33 = vperm.slane %v1104_v5, %v4286_v58  ;;  %v1124_v28 = vsel %vm729_vm5, %v978_v38, %v1123_v51  ;;  %v1315_v42 = vrot.slane %v4411_v55, 4  ;;  %v1327_v36 = vrot.slane %v4414_v29, 4 }
 0x271   : > { %v1128_v45 = vperm.slane %v1122_v50, %v4266_v41  ;;  %v1132_v46 = vperm.slane %v1124_v28, %v4266_v41  ;;  %v4441_v53 = vrot.slane %v1100_v2, 4  ;;  %v3551_v60 = vpack.i.bf16 %v4223_v17, %v978_v38 }
 0x272   : > { %v4439_v24 = vpop.permute.xlu0 %963  ;;  %v1133_v59 = vrot.slane %v4392_v34, 4  ;;  %v719_v21 = vpop.permute.xlu2 %718  ;;  %v4449_v16 = vperm.slane %v1090_v49, %v4286_v58  ;;  %v1102_v54 = vsel %vm729_vm5, %v1101_v10, %v1076_v31  ;;  %v4453_v5 = vrot.slane %v1112_v33, 4 }
 0x273   : > { %v4446_v51 = vpop.permute.xlu1 %999  ;;  %v1147_v0 = vrot.slane %v1128_v45, 4  ;;  %v1159_v2 = vrot.slane %v1132_v46, 4  ;;  %v1136_v17 = vsel %vm729_vm5, %v4392_v34, %v1135_v25  ;;  %3552 = vrot.lane.b32.xlu0 %v3551_v60, %s3880_s25  ;;  %v3556_v10 = vpack.i.bf16 %v4392_v34, %v4317_v40 }
 0x274   : > { %v1134_v50 = vsel %vm729_vm5, %v1133_v59, %v4262_v30  ;;  %v1144_v31 = vperm.slane %v1136_v17, %v4266_v41  ;;  %v785_v49 = vrot.slane %v719_v21, 4  ;;  %v4467_v33 = vperm.slane %v1102_v54, %v4286_v58 }
 0x275   : > { %v1140_v38 = vperm.slane %v1134_v50, %v4266_v41  ;;  %v4471_v28 = vsel %vm729_vm5, 0.0, %v4441_v53  ;;  %v1247_v30 = vrot.slane %v4439_v24, 4  ;;  %v1245_v25 = vrot.slane %v4446_v51, 4  ;;  %3557 = vrot.lane.b32.xlu2 %v3556_v10, %s3880_s25 }
 0x276   : > { %v1157_v59 = vrot.slane %v1144_v31, 4  ;;  %v1160_v17 = vsel %vm729_vm5, %v1144_v31, %v1159_v2  ;;  %v4480_v40 = vsel %vm729_vm5, 0.0, %v4453_v5  ;;  %v786_v27 = vsel %vm729_vm5, %v785_v49, %v4251_v23 }
 0x277   : > { %v1145_v60 = vrot.slane %v1140_v38, 4  ;;  %v1148_v50 = vsel %vm729_vm5, %v1140_v38, %v1147_v0  ;;  %v1168_v54 = vperm.slane %v1160_v17, %v4286_v58  ;;  %v788_v0 = vsel %vm729_vm5, %v719_v21, %v787_v52 }
 0x278   : > { %v1156_v34 = vperm.slane %v1148_v50, %v4286_v58  ;;  %v1158_v9 = vsel %vm729_vm5, %v1157_v59, %v1132_v46  ;;  %v4491_v2 = vperm.slane %v786_v27, %v4266_v41  ;;  %v1246_v38 = vsel %vm729_vm5, %v1245_v25, %v4439_v24 }
 0x279   : > { %v1113_v31 = vrot.slane %v4449_v16, 4  ;;  %v1146_v50 = vsel %vm729_vm5, %v1145_v60, %v1128_v45  ;;  %v1164_v49 = vperm.slane %v1158_v9, %v4286_v58  ;;  %v1404_v46 = vrot.slane %v4471_v28, 4 }
 0x27a   : > { %v1175_v59 = vrot.slane %v1168_v54, 4  ;;  %v1248_v23 = vsel %vm729_vm5, %v4446_v51, %v1247_v30  ;;  %v1252_v52 = vperm.slane %v1246_v38, %v4266_v41  ;;  %v4503_v27 = vpop.permute.xlu0 %965  ;;  %v1171_v25 = vrot.slane %v1156_v34, 4 }
 0x27b   : > { %v4507_v17 = vperm.slane %v788_v0, %v4266_v41  ;;  %v4511_v9 = vpop.permute.xlu1 %1001  ;;  %v1152_v60 = vperm.slane %v1146_v50, %v4286_v58  ;;  %v1256_v30 = vperm.slane %v1248_v23, %v4266_v41  ;;  %v1173_v39 = vrot.slane %v1164_v49, 4 }
 0x27c   : > { %v1260_v38 = vsel %vm729_vm5, %v1252_v52, %v1259_v7  ;;  %v1257_v34 = vrot.slane %v1252_v52, 4  ;;  %v1303_v11 = vrot.slane %v4503_v27, 4  ;;  %v1176_v62 = vsel %vm729_vm5, 0.0, %v1175_v59 }
 0x27d   : > { %v1268_v0 = vperm.slane %v1260_v38, %v4286_v58  ;;  %v1269_v8 = vrot.slane %v1256_v30, 4  ;;  %v1272_v50 = vsel %vm729_vm5, %v1256_v30, %v1271_v37  ;;  %v1301_v54 = vrot.slane %v4511_v9, 4 }
 0x27e   : > { %v1172_v23 = vsel %vm729_vm5, 0.0, %v1171_v25  ;;  %v1464_v1 = vsel %vm729_vm5, %v1175_v59, %v1164_v49  ;;  %v1280_v52 = vperm.slane %v1272_v50, %v4286_v58  ;;  %v1304_v21 = vsel %vm729_vm5, %v4511_v9, %v1303_v11 }
 0x27f   : > { %v1270_v38 = vsel %vm729_vm5, %v1269_v8, %v4323_v44  ;;  %v1302_v45 = vsel %vm729_vm5, %v1301_v54, %v4503_v27  ;;  %v1169_v37 = vrot.slane %v1152_v60, 4  ;;  %v1469_v30 = vrot.slane %v1176_v62, 4 }
 0x280   : > { %v1258_v10 = vsel %vm729_vm5, %v1257_v34, %v4320_v43  ;;  %v4539_v49 = vperm.slane %v1270_v38, %v4286_v58  ;;  %v4541_v59 = vrot.slane %v1268_v0, 4  ;;  %v1174_v50 = vsel %vm729_vm5, 0.0, %v1173_v39 }
 0x281   : > { %v4544_v7 = vrot.slane %v1280_v52, 4  ;;  %v1308_v44 = vperm.slane %v1302_v45, %v4266_v41  ;;  %v1312_v8 = vperm.slane %v1304_v21, %v4266_v41  ;;  %v1170_v62 = vsel %vm729_vm5, 0.0, %v1169_v37 }
 0x282   : > { %v1453_v43 = vsel %vm729_vm5, %v1171_v25, %v1152_v60  ;;  %v1458_v54 = vrot.slane %v1172_v23, 4  ;;  %v4553_v34 = vperm.slane %v1258_v10, %v4286_v58  ;;  %v4560_v21 = vsel %vm729_vm5, 0.0, %v4541_v59 }
 0x283   : > { %v1313_v0 = vrot.slane %v1308_v44, 4  ;;  %v1316_v39 = vsel %vm729_vm5, %v1308_v44, %v1315_v42  ;;  %v1325_v52 = vrot.slane %v1312_v8, 4  ;;  %v1285_v45 = vrot.slane %v4539_v49, 4 }
 0x284   : > { %v1328_v25 = vsel %vm729_vm5, %v1312_v8, %v1327_v36  ;;  %v1457_v60 = vperm.slane %v1453_v43, %v4266_v41  ;;  %v4569_v10 = vsel %vm729_vm5, 0.0, %v4544_v7  ;;  %v1324_v23 = vperm.slane %v1316_v39, %v4286_v58 }
 0x285   : > { %v1314_v42 = vsel %vm729_vm5, %v1313_v0, %v4411_v55  ;;  %v1459_v38 = vsel %vm729_vm5, %v1458_v54, %v1170_v62  ;;  %v1326_v44 = vsel %vm729_vm5, %v1325_v52, %v4414_v29  ;;  %v1336_v36 = vperm.slane %v1328_v25, %v4286_v58  ;;  %v962_v52 = vpop.permute.xlu0 %961 }
 0x286   : > { %v4576_v37 = vperm.slane %v1314_v42, %v4286_v58  ;;  %v1463_v8 = vperm.slane %v1459_v38, %v4266_v41  ;;  %v1468_v11 = vperm.slane %v1464_v1, %v4266_v41  ;;  %v1470_v55 = vsel %vm729_vm5, %v1469_v30, %v1174_v50  ;;  %v998_v30 = vpop.permute.xlu1 %997 }
 0x287   : > { %v1477_v0 = vrot.slane %v1457_v60, 4  ;;  %v1474_v29 = vperm.slane %v1470_v55, %v4266_v41  ;;  %v4591_v25 = vsel %vm729_vm5, 0.0, %v1285_v45  ;;  %v4594_v42 = vperm.slane %v1326_v44, %v4286_v58 }
 0x288   : > { %v1489_v38 = vrot.slane %v1468_v11, 4  ;;  %v4598_v62 = vrot.slane %v1324_v23, 4  ;;  %v4600_v54 = vrot.slane %v1336_v36, 4  ;;  %v1191_v45 = vrot.slane %v962_v52, 4 }
 0x289   : > { %v1478_v1 = vsel %vm729_vm5, %v1463_v8, %v1477_v0  ;;  %v3566_v43 = vpack.i.bf16 %v4373_v15, %v962_v52  ;;  %v1475_v44 = vrot.slane %v1463_v8, 4  ;;  %v1487_v0 = vrot.slane %v1474_v29, 4 }
 0x28a   : > { %v4603_v39 = vperm.slane %v1478_v1, %v4286_v58  ;;  %v1490_v55 = vsel %vm729_vm5, %v1474_v29, %v1489_v38  ;;  %v1189_v32 = vrot.slane %v998_v30, 4  ;;  %v3576_v50 = vpack.i.bf16 %v998_v30, %v4446_v51 }
 0x28b   : > { %v4608_v61 = vperm.slane %v1490_v55, %v4286_v58  ;;  %v1476_v23 = vsel %vm729_vm5, %v1475_v44, %v1457_v60  ;;  %v1192_v36 = vsel %vm729_vm5, %v998_v30, %v1191_v45  ;;  %v1114_v1 = vsel %vm729_vm5, 0.0, %v1113_v31  ;;  %3567 = vrot.lane.b32.xlu0 %v3566_v43, %s3880_s25 }
 0x28c   : > { %v1482_v8 = vperm.slane %v1476_v23, %v4286_v58  ;;  %v1488_v29 = vsel %vm729_vm5, %v1487_v0, %v1468_v11  ;;  %v1190_v38 = vsel %vm729_vm5, %v1189_v32, %v962_v52  ;;  %3577 = vrot.lane.b32.xlu1 %v3576_v50, %s3880_s25  ;;  %v1200_v30 = vperm.slane %v1192_v36, %v4266_v41 }
 0x28d   : > { %v1503_v15 = vrot.slane %v4608_v61, 4  ;;  %v1494_v51 = vperm.slane %v1488_v29, %v4286_v58  ;;  %v1196_v60 = vperm.slane %v1190_v38, %v4266_v41  ;;  %v1399_v31 = vsel %vm729_vm5, %v4441_v53, %v4449_v16 }
 0x28e   : > { %v1501_v55 = vrot.slane %v1482_v8, 4  ;;  %v1403_v11 = vperm.slane %v1399_v31, %v4266_v41  ;;  %v1405_v32 = vsel %vm729_vm5, %v1404_v46, %v1114_v1  ;;  %v5527_v45 = vrot.slane %v4420_v6, 4 }
 0x28f   : > { %v1504_v43 = vsel %vm729_vm5, %v1503_v15, %v4603_v39  ;;  %v1499_v52 = vrot.slane %v1494_v51, 4  ;;  %v1201_v50 = vrot.slane %v1196_v60, 4  ;;  %v1213_v0 = vrot.slane %v1200_v30, 4 }
 0x290   : > { %3393 = vmatpush.xpose.msk.msrb.mxu0 %vm2401_vm6, %v1504_v43  ;;  %v1204_v44 = vsel %vm729_vm5, %v1196_v60, %v5527_v45  ;;  %v5528_v16 = vrot.slane %v4427_v14, 4  ;;  %v1502_v36 = vsel %vm729_vm5, %v1494_v51, %v1501_v55  ;;  %v5529_v28 = vrot.slane %v4467_v33, 4 }
 0x291   : > { %v1212_v53 = vperm.slane %v1204_v44, %v4286_v58  ;;  %v1500_v1 = vsel %vm729_vm5, %v1499_v52, %v1482_v8  ;;  %v1214_v15 = vsel %vm729_vm5, %v1213_v0, %v4427_v14  ;;  %3389 = vmatpush.xpose.msk.msra.mxu3 %vm2401_vm6, %v1502_v36  ;;  %v1409_v38 = vperm.slane %v1405_v32, %v4266_v41 }
 0x292   : > { %v1216_v23 = vsel %vm729_vm5, %v1200_v30, %v5528_v16  ;;  %v1118_v46 = vsel %vm729_vm5, 0.0, %v5529_v28  ;;  %3385 = vmatpush.xpose.msk.msra.mxu2 %vm2401_vm6, %v1500_v1  ;;  %v1202_v51 = vsel %vm729_vm5, %v1201_v50, %v4420_v6  ;;  %v4656_v60 = vperm.slane %v1214_v15, %v4286_v58 }
 0x293   : > { %v1224_v29 = vperm.slane %v1216_v23, %v4286_v58  ;;  %v4658_v30 = vrot.slane %v1212_v53, 4  ;;  %v1410_v14 = vsel %vm729_vm5, %v4453_v5, %v4467_v33  ;;  %v5530_v43 = vrot.slane %v4480_v40, 4 }
 0x294   : > { %v1414_v31 = vperm.slane %v1410_v14, %v4266_v41  ;;  %v1423_v32 = vrot.slane %v1403_v11, 4  ;;  %v5531_v6 = vpack.i.bf16 %v4439_v24, %v4229_v19  ;;  %v4675_v52 = vsel %vm729_vm5, 0.0, %v4598_v62 }
 0x295   : > { %v4663_v8 = vrot.slane %v1224_v29, 4  ;;  %v1416_v55 = vsel %vm729_vm5, %v5530_v43, %v1118_v46  ;;  %v1341_v5 = vrot.slane %v4594_v42, 4  ;;  %v4680_v33 = vsel %vm729_vm5, 0.0, %v4600_v54 }
 0x296   : > { %3572 = vrot.lane.b32.xlu0 %v5531_v6, %s3880_s25  ;;  %v1420_v40 = vperm.slane %v1416_v55, %v4266_v41  ;;  %v5532_v50 = vpack.i.bf16 %v4315_v20, %v4503_v27  ;;  %v4688_v19 = vperm.slane %v1202_v51, %v4286_v58  ;;  %v4692_v24 = vsel %vm729_vm5, 0.0, %v4658_v30 }
 0x297   : > { %v1424_v45 = vsel %vm729_vm5, %v1409_v38, %v1423_v32  ;;  %v1435_v44 = vrot.slane %v1414_v31, 4  ;;  %v1229_v0 = vrot.slane %v4656_v60, 4  ;;  %v4698_v53 = vsel %vm729_vm5, 0.0, %v4663_v8 }
 0x298   : > { %3582 = vrot.lane.b32.xlu1 %v5532_v50, %s3880_s25  ;;  %v4701_v16 = vperm.slane %v1424_v45, %v4286_v58  ;;  %v1421_v20 = vrot.slane %v1409_v38, 4  ;;  %v1433_v23 = vrot.slane %v1420_v40, 4  ;;  %v5533_v36 = vrot.slane %v4328_v47, 4 }
 0x299   : > { %v1436_v27 = vsel %vm729_vm5, %v1420_v40, %v1435_v44  ;;  %v5534_v46 = vrot.slane %v4335_v56, 4  ;;  %v1345_v38 = vsel %vm729_vm5, %v4312_v35, %v4328_v47  ;;  %v5535_v51 = vrot.slane %v4341_v63, 4  ;;  %v713_v40 = vpop.permute.xlu0 %712 }
 0x29a   : > { %v1058_v28 = vsel %vm729_vm5, 0.0, %v5533_v36  ;;  %v4711_v15 = vperm.slane %v1436_v27, %v4286_v58  ;;  %v1422_v29 = vsel %vm729_vm5, %v1421_v20, %v1403_v11  ;;  %v1434_v55 = vsel %vm729_vm5, %v1433_v23, %v1414_v31  ;;  %v725_v27 = vpop.permute.xlu1 %724 }
 0x29b   : > { %v1062_v1 = vsel %vm729_vm5, 0.0, %v5534_v46  ;;  %v1351_v14 = vsel %vm729_vm5, %v5535_v51, %v1058_v28  ;;  %v1428_v43 = vperm.slane %v1422_v29, %v4286_v58  ;;  %v1349_v32 = vperm.slane %v1345_v38, %v4266_v41 }
 0x29c   : > { %v1355_v6 = vperm.slane %v1351_v14, %v4266_v41  ;;  %v1449_v50 = vrot.slane %v4711_v15, 4  ;;  %v1440_v11 = vperm.slane %v1434_v55, %v4286_v58  ;;  %v1356_v35 = vsel %vm729_vm5, %v4330_v48, %v4335_v56 }
 0x29d   : > { %v5536_v47 = vrot.slane %v4348_v3, 4  ;;  %v1447_v45 = vrot.slane %v1428_v43, 4  ;;  %v1360_v31 = vperm.slane %v1356_v35, %v4266_v41  ;;  %v1369_v20 = vrot.slane %v1349_v32, 4 }
 0x29e   : > { %v1450_v23 = vsel %vm729_vm5, %v1449_v50, %v4701_v16  ;;  %v1445_v36 = vrot.slane %v1440_v11, 4  ;;  %v799_v28 = vrot.slane %v713_v40, 4  ;;  %v1367_v46 = vrot.slane %v1355_v6, 4 }
 0x29f   : > { %v1362_v63 = vsel %vm729_vm5, %v5536_v47, %v1062_v1  ;;  %v5537_v48 = vpack.i.bf16 %v4511_v9, %v4284_v57  ;;  %3394 = vmatpush.xpose.msk.msrb.mxu0 %vm2401_vm6, %v1450_v23  ;;  %v1448_v56 = vsel %vm729_vm5, %v1440_v11, %v1447_v45  ;;  %v1370_v3 = vsel %vm729_vm5, %v1355_v6, %v1369_v20 }
 0x2a0   : > { %v1366_v44 = vperm.slane %v1362_v63, %v4266_v41  ;;  %v1381_v1 = vrot.slane %v1360_v31, 4  ;;  %v1446_v38 = vsel %vm729_vm5, %v1445_v36, %v1428_v43  ;;  %3390 = vmatpush.xpose.msk.msra.mxu3 %vm2401_vm6, %v1448_v56  ;;  %v4746_v51 = vperm.slane %v1370_v3, %v4286_v58 }
 0x2a1   : > { %3587 = vrot.lane.b32.xlu1 %v5537_v48, %s3880_s25  ;;  %v1368_v14 = vsel %vm729_vm5, %v1367_v46, %v1349_v32  ;;  %v797_v55 = vrot.slane %v725_v27, 4  ;;  %3386 = vmatpush.xpose.msk.msra.mxu2 %vm2401_vm6, %v1446_v38  ;;  %v800_v50 = vsel %vm729_vm5, %v725_v27, %v799_v28  ;;  %v5538_v63 = vrot.slane %v4351_v4, 4 }
 0x2a2   : > { %v1379_v29 = vrot.slane %v1366_v44, 4  ;;  %v1382_v57 = vsel %vm729_vm5, %v1366_v44, %v1381_v1  ;;  %v1374_v9 = vperm.slane %v1368_v14, %v4286_v58  ;;  %v808_v32 = vperm.slane %v800_v50, %v4266_v41 }
 0x2a3   : > { %v4755_v43 = vperm.slane %v1382_v57, %v4286_v58  ;;  %v798_v35 = vsel %vm729_vm5, %v797_v55, %v713_v40  ;;  %v782_v45 = vsel %vm729_vm5, 0.0, %v5538_v63  ;;  %v856_v20 = vperm.slane %v4367_v13, %v4266_v41 }
 0x2a4   : > { %v1380_v6 = vsel %vm729_vm5, %v1379_v29, %v1360_v31  ;;  %v804_v47 = vperm.slane %v798_v35, %v4266_v41  ;;  %v5539_v31 = vrot.slane %v4363_v12, 4  ;;  %v821_v40 = vrot.slane %v808_v32, 4 }
 0x2a5   : > { %v1386_v11 = vperm.slane %v1380_v6, %v4286_v58  ;;  %v1395_v27 = vrot.slane %v4755_v43, 4  ;;  %v5540_v36 = vrot.slane %v4507_v17, 4  ;;  %v5541_v4 = vrot.slane %v4491_v2, 4 }
 0x2a6   : > { %v847_v44 = vsel %vm729_vm5, %v5539_v31, %v4376_v22  ;;  %v809_v46 = vrot.slane %v804_v47, 4  ;;  %v822_v1 = vsel %vm729_vm5, %v821_v40, %v4507_v17  ;;  %v5542_v55 = vrot.slane %v4385_v18, 4 }
 0x2a7   : > { %v1391_v23 = vrot.slane %v1386_v11, 4  ;;  %v824_v28 = vsel %vm729_vm5, %v808_v32, %v5540_v36  ;;  %v812_v48 = vsel %vm729_vm5, %v804_v47, %v5541_v4  ;;  %v851_v22 = vperm.slane %v847_v44, %v4266_v41 }
 0x2a8   : > { %v832_v12 = vperm.slane %v824_v28, %v4286_v58  ;;  %v1396_v13 = vsel %vm729_vm5, %v1395_v27, %v4746_v51  ;;  %v820_v3 = vperm.slane %v812_v48, %v4286_v58  ;;  %v810_v29 = vsel %vm729_vm5, %v809_v46, %v4491_v2 }
 0x2a9   : > { %v1392_v56 = vsel %vm729_vm5, %v1391_v23, %v1374_v9  ;;  %3395 = vmatpush.xpose.msk.msrb.mxu0 %vm2401_vm6, %v1396_v13  ;;  %v828_v38 = vperm.slane %v822_v1, %v4286_v58  ;;  %v858_v57 = vsel %vm729_vm5, %v5542_v55, %v782_v45  ;;  %v4794_v6 = vperm.slane %v810_v29, %v4286_v58 }
 0x2aa   : > { %3387 = vmatpush.xpose.msk.msra.mxu2 %vm2401_vm6, %v1392_v56  ;;  %v839_v14 = vrot.slane %v832_v12, 4  ;;  %v835_v50 = vrot.slane %v820_v3, 4  ;;  %v862_v17 = vperm.slane %v858_v57, %v4266_v41  ;;  %v865_v35 = vrot.slane %v4379_v26, 4 }
 0x2ab   : > { %v1342_v32 = vsel %vm729_vm5, 0.0, %v1341_v5  ;;  %v1620_v2 = vrot.slane %v4675_v52, 4  ;;  %v1631_v47 = vrot.slane %v4680_v33, 4  ;;  %v877_v63 = vrot.slane %v856_v20, 4 }
 0x2ac   : > { %v1225_v18 = vrot.slane %v4688_v19, 4  ;;  %v1512_v45 = vrot.slane %v4692_v24, 4  ;;  %v837_v31 = vrot.slane %v828_v38, 4  ;;  %v840_v44 = vsel %vm729_vm5, 0.0, %v839_v14 }
 0x2ad   : > { %v4809_v27 = vsel %vm729_vm5, 0.0, %v1229_v0  ;;  %v1523_v23 = vrot.slane %v4698_v53, 4  ;;  %v906_v5 = vsel %vm729_vm5, %v839_v14, %v828_v38  ;;  %v866_v52 = vsel %vm729_vm5, %v851_v22, %v865_v35 }
 0x2ae   : > { %v833_v33 = vrot.slane %v4794_v6, 4  ;;  %v4816_v40 = vsel %vm729_vm5, 0.0, %v835_v50  ;;  %v4820_v36 = vsel %vm729_vm5, %v835_v50, %v4794_v6  ;;  %v878_v28 = vsel %vm729_vm5, %v862_v17, %v877_v63 }
 0x2af   : > { %v911_v46 = vrot.slane %v840_v44, 4  ;;  %v886_v0 = vperm.slane %v878_v28, %v4286_v58  ;;  %v1505_v4 = vrot.slane %v4603_v39, 4  ;;  %v1393_v48 = vrot.slane %v1374_v9, 4 }
 0x2b0   : > { %v838_v12 = vsel %vm729_vm5, 0.0, %v837_v31  ;;  %v863_v13 = vrot.slane %v851_v22, 4  ;;  %v875_v56 = vrot.slane %v862_v17, 4  ;;  %v1451_v3 = vrot.slane %v4701_v16, 4 }
 0x2b1   : > { %v874_v1 = vperm.slane %v866_v52, %v4286_v58  ;;  %v891_v29 = vrot.slane %v886_v0, 4  ;;  %v1506_v38 = vsel %vm729_vm5, %v4608_v61, %v1505_v4  ;;  %v1394_v14 = vsel %vm729_vm5, %v1386_v11, %v1393_v48 }
 0x2b2   : > { %v900_v55 = vrot.slane %v4816_v40, 4  ;;  %v4833_v57 = vperm.slane %v906_v5, %v4266_v41  ;;  %3397 = vmatpush.xpose.msk.msrb.mxu2 %vm2401_vm6, %v1506_v38  ;;  %3391 = vmatpush.xpose.msk.msra.mxu3 %vm2401_vm6, %v1394_v14  ;;  %v864_v39 = vsel %vm729_vm5, %v863_v13, %v4379_v26  ;;  %v876_v16 = vsel %vm729_vm5, %v875_v56, %v856_v20 }
 0x2b3   : > { %v4841_v9 = vsel %vm729_vm5, %v911_v46, %v838_v12  ;;  %v892_v61 = vsel %vm729_vm5, %v891_v29, %v874_v1  ;;  %v870_v11 = vperm.slane %v864_v39, %v4286_v58  ;;  %v882_v22 = vperm.slane %v876_v16, %v4286_v58 }
 0x2b4   : > { %3396 = vmatmul.msk.f32.vlgmr.msrb.gmra.mxu0 %vm2401_vm6, %v892_v61  ;;  %v1452_v50 = vsel %vm729_vm5, %v4711_v15, %v1451_v3  ;;  %v5543_v17 = vrot.slane %v4576_v37, 4  ;;  %v1615_v20 = vsel %vm729_vm5, %v4598_v62, %v4576_v37  ;;  %v1626_v35 = vsel %vm729_vm5, %v4600_v54, %v4594_v42 }
 0x2b5   : > { %v887_v63 = vrot.slane %v882_v22, 4  ;;  %v889_v31 = vrot.slane %v870_v11, 4  ;;  %v1619_v44 = vperm.slane %v1615_v20, %v4266_v41  ;;  %v1630_v52 = vperm.slane %v1626_v35, %v4266_v41 }
 0x2b6   : > { %v1338_v26 = vsel %vm729_vm5, 0.0, %v5543_v17  ;;  %3398 = vmatpush.xpose.msk.msrb.mxu2 %vm2401_vm6, %v1452_v50  ;;  %v1632_v28 = vsel %vm729_vm5, %v1631_v47, %v1342_v32  ;;  %v1397_v37 = vrot.slane %v4746_v51, 4  ;;  %v893_v12 = vrot.slane %v874_v1, 4 }
 0x2b7   : > { %v1621_v5 = vsel %vm729_vm5, %v1620_v2, %v1338_v26  ;;  %v888_v62 = vsel %vm729_vm5, %v887_v63, %v870_v11  ;;  %v890_v54 = vsel %vm729_vm5, %v882_v22, %v889_v31  ;;  %v1636_v42 = vperm.slane %v1632_v28, %v4266_v41 }
 0x2b8   : > { %v1625_v15 = vperm.slane %v1621_v5, %v4266_v41  ;;  %v1639_v46 = vrot.slane %v1619_v44, 4  ;;  %3388 = vmatmul.msk.f32.vlgmr.msra.gmra.mxu2 %vm2401_vm6, %v888_v62  ;;  %3392 = vmatmul.msk.f32.vlgmr.msra.gmra.mxu3 %vm2401_vm6, %v890_v54  ;;  %v1651_v4 = vrot.slane %v1630_v52, 4  ;;  %v1398_v48 = vsel %vm729_vm5, %v4755_v43, %v1397_v37 }
 0x2b9   : > { %v1649_v32 = vrot.slane %v1636_v42, 4  ;;  %v5544_v47 = vrot.slane %v4553_v34, 4  ;;  %v1561_v56 = vsel %vm729_vm5, %v4541_v59, %v4553_v34  ;;  %v894_v1 = vsel %vm729_vm5, %v886_v0, %v893_v12 }
 0x2ba   : > { %v1637_v2 = vrot.slane %v1625_v15, 4  ;;  %v1640_v51 = vsel %vm729_vm5, %v1625_v15, %v1639_v46  ;;  %3399 = vmatpush.xpose.msk.msrb.mxu2 %vm2401_vm6, %v1398_v48  ;;  %v1652_v43 = vsel %vm729_vm5, %v1636_v42, %v1651_v4  ;;  %v1565_v59 = vperm.slane %v1561_v56, %v4266_v41 }
 0x2bb   : > { %v1282_v13 = vsel %vm729_vm5, 0.0, %v5544_v47  ;;  %v4882_v29 = vperm.slane %v1640_v51, %v4286_v58  ;;  %v1650_v14 = vsel %vm729_vm5, %v1649_v32, %v1630_v52  ;;  %v4889_v39 = vperm.slane %v1652_v43, %v4286_v58 }
 0x2bc   : > { %v1638_v3 = vsel %vm729_vm5, %v1637_v2, %v1619_v44  ;;  %v1656_v34 = vperm.slane %v1650_v14, %v4286_v58  ;;  %v5545_v16 = vrot.slane %v4560_v21, 4  ;;  %v1572_v11 = vsel %vm729_vm5, %v4544_v7, %v4539_v49 }
 0x2bd   : > { %v1644_v38 = vperm.slane %v1638_v3, %v4286_v58  ;;  %v5546_v0 = vrot.slane %v4569_v10, 4  ;;  %v1665_v17 = vrot.slane %v4889_v39, 4  ;;  %v1576_v20 = vperm.slane %v1572_v11, %v4266_v41 }
 0x2be   : > { %v1567_v61 = vsel %vm729_vm5, %v5545_v16, %v1282_v13  ;;  %v1661_v35 = vrot.slane %v1656_v34, 4  ;;  %v1585_v63 = vrot.slane %v1565_v59, 4  ;;  %v1226_v7 = vsel %vm729_vm5, 0.0, %v1225_v18 }
 0x2bf   : > { %v1578_v22 = vsel %vm729_vm5, %v5546_v0, %v4591_v25  ;;  %v1663_v50 = vrot.slane %v1644_v38, 4  ;;  %v1571_v26 = vperm.slane %v1567_v61, %v4266_v41  ;;  %v1666_v10 = vsel %vm729_vm5, %v1665_v17, %v4882_v29 }
 0x2c0   : > { %v1582_v21 = vperm.slane %v1578_v22, %v4266_v41  ;;  %v1597_v31 = vrot.slane %v1576_v20, 4  ;;  %v1662_v44 = vsel %vm729_vm5, %v1661_v35, %v1644_v38  ;;  %3409 = vmatpush.xpose.msk.msra.mxu2 %vm2401_vm6, %v1666_v10  ;;  %v1507_v18 = vsel %vm729_vm5, %v4658_v30, %v4688_v19 }
 0x2c1   : > { %v1664_v49 = vsel %vm729_vm5, %v1656_v34, %v1663_v50  ;;  %v1583_v25 = vrot.slane %v1571_v26, 4  ;;  %v1586_v15 = vsel %vm729_vm5, %v1571_v26, %v1585_v63  ;;  %v931_v52 = vrot.slane %v4833_v57, 4  ;;  %3401 = vmatpush.xpose.msk.msrb.mxu3 %vm2401_vm6, %v1662_v44  ;;  %3400 = vmatmul.msk.f32.vlgmr.msrb.gmra.mxu2 %vm2401_vm6, %v894_v1 }
 0x2c2   : > { %3405 = vmatpush.xpose.msk.msra.mxu0 %vm2401_vm6, %v1664_v49  ;;  %v1595_v5 = vrot.slane %v1582_v21, 4  ;;  %v4925_v37 = vperm.slane %v1586_v15, %v4286_v58  ;;  %v1598_v62 = vsel %vm729_vm5, %v1582_v21, %v1597_v31  ;;  %v1511_v30 = vperm.slane %v1507_v18, %v4266_v41 }
 0x2c3   : > { %v1584_v28 = vsel %vm729_vm5, %v1583_v25, %v1565_v59  ;;  %v4931_v46 = vperm.slane %v1598_v62, %v4286_v58  ;;  %v1513_v2 = vsel %vm729_vm5, %v1512_v45, %v1226_v7  ;;  %v1518_v4 = vsel %vm729_vm5, %v4663_v8, %v4656_v60  ;;  %v4950_v45 = vpop.permute.xlu0 %3532 }
 0x2c4   : > { %v1590_v54 = vperm.slane %v1584_v28, %v4286_v58  ;;  %v1596_v42 = vsel %vm729_vm5, %v1595_v5, %v1576_v20  ;;  %v1524_v48 = vsel %vm729_vm5, %v1523_v23, %v4809_v27  ;;  %v1517_v51 = vperm.slane %v1513_v2, %v4266_v41 }
 0x2c5   : > { %v1602_v19 = vperm.slane %v1596_v42, %v4286_v58  ;;  %v1611_v32 = vrot.slane %v4931_v46, 4  ;;  %v1522_v47 = vperm.slane %v1518_v4, %v4266_v41  ;;  %v916_v24 = vperm.slane %v4841_v9, %v4266_v41 }
 0x2c6   : > { %v1609_v12 = vrot.slane %v1590_v54, 4  ;;  %v1528_v60 = vperm.slane %v1524_v48, %v4266_v41  ;;  %v1531_v8 = vrot.slane %v1511_v30, 4  ;;  %v1529_v23 = vrot.slane %v1517_v51, 4  ;;  %v4963_v38 = vpop.permute.xlu2 %3547 }
 0x2c7   : > { %v1607_v13 = vrot.slane %v1602_v19, 4  ;;  %v1612_v27 = vsel %vm729_vm5, %v1611_v32, %v4925_v37  ;;  %v1543_v56 = vrot.slane %v1522_v47, 4  ;;  %v834_v3 = vsel %vm729_vm5, 0.0, %v833_v33 }
 0x2c8   : > { %v1610_v53 = vsel %vm729_vm5, %v1602_v19, %v1609_v12  ;;  %3410 = vmatpush.xpose.msk.msra.mxu2 %vm2401_vm6, %v1612_v27  ;;  %v1541_v9 = vrot.slane %v1528_v60, 4  ;;  %v1532_v1 = vsel %vm729_vm5, %v1517_v51, %v1531_v8  ;;  %v1530_v14 = vsel %vm729_vm5, %v1529_v23, %v1511_v30 }
 0x2c9   : > { %v1608_v43 = vsel %vm729_vm5, %v1607_v13, %v1590_v54  ;;  %3406 = vmatpush.xpose.msk.msra.mxu0 %vm2401_vm6, %v1610_v53  ;;  %v1667_v59 = vrot.slane %v4882_v29, 4  ;;  %v1544_v6 = vsel %vm729_vm5, %v1528_v60, %v1543_v56  ;;  %v899_v33 = vperm.slane %v4820_v36, %v4266_v41 }
 0x2ca   : > { %3402 = vmatpush.xpose.msk.msrb.mxu3 %vm2401_vm6, %v1608_v43  ;;  %v1536_v34 = vperm.slane %v1530_v14, %v4286_v58  ;;  %v1542_v16 = vsel %vm729_vm5, %v1541_v9, %v1522_v47  ;;  %v1540_v61 = vperm.slane %v1532_v1, %v4286_v58  ;;  %v1552_v11 = vperm.slane %v1544_v6, %v4286_v58 }
 0x2cb   : > { %v1548_v0 = vperm.slane %v1542_v16, %v4286_v58  ;;  %v901_v22 = vsel %vm729_vm5, %v900_v55, %v834_v3  ;;  %v919_v29 = vrot.slane %v899_v33, 4  ;;  %v932_v50 = vsel %vm729_vm5, %v916_v24, %v931_v52  ;;  %v3543_v49 = vpop.permute.xlu0 %3542 }
 0x2cc   : > { %v1555_v17 = vrot.slane %v1536_v34, 4  ;;  %v1557_v26 = vrot.slane %v1552_v11, 4  ;;  %v905_v36 = vperm.slane %v901_v22, %v4266_v41  ;;  %v4982_v20 = vperm.slane %v932_v50, %v4286_v58 }
 0x2cd   : > { %v1553_v35 = vrot.slane %v1548_v0, 4  ;;  %v929_v21 = vrot.slane %v916_v24, 4  ;;  %v1668_v15 = vsel %vm729_vm5, %v4889_v39, %v1667_v59  ;;  %v1613_v18 = vrot.slane %v4925_v37, 4 }
 0x2ce   : > { %v1556_v63 = vsel %vm729_vm5, %v1548_v0, %v1555_v17  ;;  %v1558_v7 = vsel %vm729_vm5, %v1557_v26, %v1540_v61  ;;  %v920_v40 = vsel %vm729_vm5, %v905_v36, %v919_v29  ;;  %v945_v55 = vrot.slane %v4982_v20, 4 }
 0x2cf   : > { %v3538_v10 = vpop.permute.xlu1 %3537  ;;  %v1554_v25 = vsel %vm729_vm5, %v1553_v35, %v1536_v34  ;;  %3407 = vmatpush.xpose.msk.msra.mxu0 %vm2401_vm6, %v1556_v63  ;;  %3411 = vmatpush.xpose.msk.msra.mxu2 %vm2401_vm6, %v1558_v7  ;;  %v928_v31 = vperm.slane %v920_v40, %v4286_v58  ;;  %v917_v44 = vrot.slane %v905_v36, 4  ;;  %v930_v5 = vsel %vm729_vm5, %v929_v21, %v4833_v57  ;;  %v5005_v39 = vpop.permute.xlu2 %3557 }
 0x2d0   : > { %3403 = vmatpush.xpose.msk.msrb.mxu3 %vm2401_vm6, %v1554_v25  ;;  %v936_v52 = vperm.slane %v930_v5, %v4286_v58  ;;  %v3545_v54 = vunpack.i.h.bf16 %v3543_v49  ;;  %v1559_v30 = vrot.slane %v1540_v61, 4  ;;  %v3550_v19 = vunpack.i.h.bf16 %v4963_v38 }
 0x2d1   : > { %v946_v28 = vsel %vm729_vm5, %v945_v55, %v928_v31  ;;  %v918_v62 = vsel %vm729_vm5, %v917_v44, %v899_v33  ;;  %v3549_v37 = vunpack.i.l.bf16 %v4963_v38  ;;  %v3544_v4 = vunpack.i.l.bf16 %v3543_v49 }
 0x2d2   : > { %3412 = vmatmul.msk.f32.vlgmr.msra.gmra.mxu2 %vm2401_vm6, %v946_v28  ;;  %v924_v57 = vperm.slane %v918_v62, %v4286_v58  ;;  %v941_v42 = vrot.slane %v936_v52, 4  ;;  %v1809_v2 = vrot.slane %v3545_v54, 4  ;;  %v1614_v48 = vsel %vm729_vm5, %v4931_v46, %v1613_v18 }
 0x2d3   : > { %v3559_v51 = vunpack.i.l.bf16 %v5005_v39  ;;  %v1560_v47 = vsel %vm729_vm5, %v1552_v11, %v1559_v30  ;;  %v1811_v13 = vrot.slane %v3550_v19, 4  ;;  %v947_v46 = vrot.slane %v928_v31, 4 }
 0x2d4   : > { %3413 = vmatpush.xpose.msk.msra.mxu3 %vm2401_vm6, %v1668_v15  ;;  %v942_v12 = vsel %vm729_vm5, %v941_v42, %v924_v57  ;;  %v943_v32 = vrot.slane %v924_v57, 4  ;;  %v1810_v60 = vsel %vm729_vm5, %v1809_v2, %v3550_v19  ;;  %v1743_v53 = vrot.slane %v3549_v37, 4 }
 0x2d5   : > { %3404 = vmatmul.msk.f32.vlgmr.msrb.gmra.mxu3 %vm2401_vm6, %v942_v12  ;;  %v1741_v27 = vrot.slane %v3544_v4, 4  ;;  %v3540_v23 = vunpack.i.h.bf16 %v3538_v10  ;;  %v1812_v56 = vsel %vm729_vm5, %v3545_v54, %v1811_v13  ;;  %v1797_v3 = vrot.slane %v3559_v51, 4 }
 0x2d6   : > { %v944_v24 = vsel %vm729_vm5, %v936_v52, %v943_v32  ;;  %v3539_v43 = vunpack.i.l.bf16 %v3538_v10  ;;  %v1816_v1 = vperm.slane %v1810_v60, %v4266_v41  ;;  %v1744_v38 = vsel %vm729_vm5, %v3544_v4, %v1743_v53 }
 0x2d7   : > { %v3563_v8 = vpop.permute.xlu1 %3562  ;;  %3408 = vmatmul.msk.f32.vlgmr.msra.gmra.mxu0 %vm2401_vm6, %v944_v24  ;;  %v1755_v14 = vrot.slane %v3540_v23, 4  ;;  %v1820_v34 = vperm.slane %v1812_v56, %v4266_v41  ;;  %v1742_v16 = vsel %vm729_vm5, %v1741_v27, %v3549_v37  ;;  %v948_v0 = vsel %vm729_vm5, %v4982_v20, %v947_v46 }
 0x2d8   : > { %3414 = vmatpush.xpose.msk.msra.mxu3 %vm2401_vm6, %v1614_v48  ;;  %v3564_v9 = vunpack.i.l.bf16 %v3563_v8  ;;  %v1753_v59 = vrot.slane %v3539_v43, 4  ;;  %v1752_v22 = vperm.slane %v1744_v38, %v4266_v41  ;;  %v1821_v17 = vrot.slane %v1816_v1, 4 }
 0x2d9   : > { %v1756_v61 = vsel %vm729_vm5, %v3539_v43, %v1755_v14  ;;  %v1748_v21 = vperm.slane %v1742_v16, %v4266_v41  ;;  %v3560_v63 = vunpack.i.h.bf16 %v5005_v39  ;;  %v3565_v7 = vunpack.i.h.bf16 %v3563_v8 }
 0x2da   : > { %v1798_v6 = vsel %vm729_vm5, %v1797_v3, %v3564_v9  ;;  %v1799_v33 = vrot.slane %v3564_v9, 4  ;;  %v1754_v29 = vsel %vm729_vm5, %v1753_v59, %v3540_v23  ;;  %v1764_v26 = vperm.slane %v1756_v61, %v4266_v41 }
 0x2db   : > { %v1804_v11 = vperm.slane %v1798_v6, %v4266_v41  ;;  %v1833_v20 = vrot.slane %v1820_v34, 4  ;;  %v1760_v40 = vperm.slane %v1754_v29, %v4266_v41  ;;  %v1779_v25 = vrot.slane %v1752_v22, 4 }
 0x2dc   : > { %3415 = vmatpush.xpose.msk.msra.mxu3 %vm2401_vm6, %v1560_v47  ;;  %v1800_v50 = vsel %vm729_vm5, %v3559_v51, %v1799_v33  ;;  %v1777_v31 = vrot.slane %v1764_v26, 4  ;;  %v1767_v15 = vrot.slane %v1748_v21, 4  ;;  %v1865_v18 = vrot.slane %v3560_v63, 4 }
 0x2dd   : > { %v1808_v36 = vperm.slane %v1800_v50, %v4266_v41  ;;  %v1823_v35 = vrot.slane %v1804_v11, 4  ;;  %v1822_v55 = vsel %vm729_vm5, %v1821_v17, %v1804_v11  ;;  %v1867_v52 = vrot.slane %v3565_v7, 4 }
 0x2de   : > { %v1828_v28 = vperm.slane %v1822_v55, %v4286_v58  ;;  %v1765_v62 = vrot.slane %v1760_v40, 4  ;;  %v1780_v54 = vsel %vm729_vm5, %v1764_v26, %v1779_v25  ;;  %v1768_v30 = vsel %vm729_vm5, %v1760_v40, %v1767_v15 }
 0x2df   : > { %3416 = vmatmul.msk.f32.vlgmr.msra.gmra.mxu3 %vm2401_vm6, %v948_v0  ;;  %v1824_v49 = vsel %vm729_vm5, %v1816_v1, %v1823_v35  ;;  %v1834_v44 = vsel %vm729_vm5, %v1833_v20, %v1808_v36  ;;  %v1835_v5 = vrot.slane %v1808_v36, 4  ;;  %v1866_v37 = vsel %vm729_vm5, %v1865_v18, %v3565_v7 }
 0x2e0   : > { %v1832_v10 = vperm.slane %v1824_v49, %v4286_v58  ;;  %v1840_v19 = vperm.slane %v1834_v44, %v4286_v58  ;;  %v1778_v2 = vsel %vm729_vm5, %v1777_v31, %v1752_v22  ;;  %v1788_v48 = vperm.slane %v1780_v54, %v4286_v58 }
 0x2e1   : > { %v1836_v57 = vsel %vm729_vm5, %v1820_v34, %v1835_v5  ;;  %v1845_v12 = vrot.slane %v1828_v28, 4  ;;  %v1868_v51 = vsel %vm729_vm5, %v3560_v63, %v1867_v52  ;;  %v1766_v47 = vsel %vm729_vm5, %v1765_v62, %v1748_v21 }
 0x2e2   : > { %v1847_v42 = vrot.slane %v1832_v10, 4  ;;  %v1844_v39 = vperm.slane %v1836_v57, %v4286_v58  ;;  %v1776_v24 = vperm.slane %v1768_v30, %v4286_v58  ;;  %v1872_v13 = vperm.slane %v1866_v37, %v4266_v41 }
 0x2e3   : > { %v5057_v46 = vperm.slane %v1778_v2, %v4286_v58  ;;  %v1849_v53 = vrot.slane %v1840_v19, 4  ;;  %v1876_v56 = vperm.slane %v1868_v51, %v4266_v41  ;;  %v5061_v9 = vrot.slane %v1788_v48, 4 }
 0x2e4   : > { %v1848_v4 = vsel %vm729_vm5, 0.0, %v1847_v42  ;;  %v1851_v32 = vrot.slane %v1844_v39, 4  ;;  %v1846_v1 = vsel %vm729_vm5, 0.0, %v1845_v12  ;;  %v1772_v14 = vperm.slane %v1766_v47, %v4286_v58 }
 0x2e5   : > { %v2136_v60 = vrot.slane %v1848_v4, 4  ;;  %v3553_v8 = vpop.permute.xlu0 %3552  ;;  %v1791_v59 = vrot.slane %v1776_v24, 4  ;;  %v1793_v34 = vrot.slane %v5057_v46, 4  ;;  %v1850_v16 = vsel %vm729_vm5, 0.0, %v1849_v53 }
 0x2e6   : > { %v1852_v27 = vsel %vm729_vm5, 0.0, %v1851_v32  ;;  %v3555_v23 = vunpack.i.h.bf16 %v3553_v8  ;;  %v3554_v43 = vunpack.i.l.bf16 %v3553_v8  ;;  %v1877_v61 = vrot.slane %v1872_v13, 4 }
 0x2e7   : > { %v2147_v3 = vrot.slane %v1852_v27, 4  ;;  %v2137_v33 = vsel %vm729_vm5, %v2136_v60, %v1846_v1  ;;  %v1889_v0 = vrot.slane %v1876_v56, 4  ;;  %v2142_v36 = vsel %vm729_vm5, %v1851_v32, %v1840_v19 }
 0x2e8   : > { %v1855_v38 = vrot.slane %v3555_v23, 4  ;;  %v1853_v6 = vrot.slane %v3554_v43, 4  ;;  %v5074_v26 = vperm.slane %v2137_v33, %v4266_v41  ;;  %v1792_v21 = vsel %vm729_vm5, 0.0, %v1791_v59 }
 0x2e9   : > { %v2148_v50 = vsel %vm729_vm5, %v2147_v3, %v1850_v16  ;;  %v1796_v63 = vsel %vm729_vm5, 0.0, %v5061_v9  ;;  %v2131_v10 = vsel %vm729_vm5, %v1847_v42, %v1828_v28  ;;  %v5090_v44 = vperm.slane %v2142_v36, %v4266_v41 }
 0x2ea   : > { %v1856_v11 = vsel %vm729_vm5, %v3554_v43, %v1855_v38  ;;  %v1854_v22 = vsel %vm729_vm5, %v1853_v6, %v3555_v23  ;;  %v5078_v35 = vperm.slane %v2148_v50, %v4266_v41  ;;  %v2153_v62 = vrot.slane %v5074_v26, 4 }
 0x2eb   : > { %v1864_v29 = vperm.slane %v1856_v11, %v4266_v41  ;;  %v1860_v17 = vperm.slane %v1854_v22, %v4266_v41  ;;  %v1789_v54 = vrot.slane %v1772_v14, 4  ;;  %v2093_v28 = vrot.slane %v1796_v63, 4 }
 0x2ec   : > { %v2165_v5 = vrot.slane %v5078_v35, 4  ;;  %v2135_v30 = vperm.slane %v2131_v10, %v4266_v41  ;;  %v1794_v39 = vsel %vm729_vm5, 0.0, %v1793_v34  ;;  %v2082_v37 = vrot.slane %v1792_v21, 4 }
 0x2ed   : > { %v1890_v7 = vsel %vm729_vm5, %v1889_v0, %v1864_v29  ;;  %v1891_v20 = vrot.slane %v1864_v29, 4  ;;  %v1878_v40 = vsel %vm729_vm5, %v1877_v61, %v1860_v17  ;;  %v1879_v55 = vrot.slane %v1860_v17, 4 }
 0x2ee   : > { %v1896_v49 = vperm.slane %v1890_v7, %v4286_v58  ;;  %v1884_v25 = vperm.slane %v1878_v40, %v4286_v58  ;;  %v2166_v19 = vsel %vm729_vm5, %v2165_v5, %v5090_v44  ;;  %v2154_v51 = vsel %vm729_vm5, %v2153_v62, %v2135_v30 }
 0x2ef   : > { %v1892_v31 = vsel %vm729_vm5, %v1876_v56, %v1891_v20  ;;  %v1880_v15 = vsel %vm729_vm5, %v1872_v13, %v1879_v55  ;;  %v2172_v60 = vperm.slane %v2166_v19, %v4286_v58  ;;  %v1790_v23 = vsel %vm729_vm5, 0.0, %v1789_v54 }
 0x2f0   : > { %v1900_v18 = vperm.slane %v1892_v31, %v4286_v58  ;;  %v1905_v52 = vrot.slane %v1896_v49, 4  ;;  %v1888_v57 = vperm.slane %v1880_v15, %v4286_v58  ;;  %v1901_v2 = vrot.slane %v1884_v25, 4 }
 0x2f1   : > { %v2077_v43 = vsel %vm729_vm5, %v1791_v59, %v1772_v14  ;;  %v2083_v1 = vsel %vm729_vm5, %v2082_v37, %v1790_v23  ;;  %v2088_v34 = vsel %vm729_vm5, %v5061_v9, %v5057_v46  ;;  %v2094_v11 = vsel %vm729_vm5, %v2093_v28, %v1794_v39 }
 0x2f2   : > { %v1907_v42 = vrot.slane %v1900_v18, 4  ;;  %v1903_v4 = vrot.slane %v1888_v57, 4  ;;  %v1906_v48 = vsel %vm729_vm5, 0.0, %v1905_v52  ;;  %v1902_v56 = vsel %vm729_vm5, 0.0, %v1901_v2 }
 0x2f3   : > { %v2087_v33 = vperm.slane %v2083_v1, %v4266_v41  ;;  %v2081_v61 = vperm.slane %v2077_v43, %v4266_v41  ;;  %v5125_v59 = vperm.slane %v2094_v11, %v4266_v41  ;;  %v2160_v17 = vperm.slane %v2154_v51, %v4286_v58 }
 0x2f4   : > { %v1908_v12 = vsel %vm729_vm5, 0.0, %v1907_v42  ;;  %v2196_v32 = vsel %vm729_vm5, %v1907_v42, %v1896_v49  ;;  %v1904_v47 = vsel %vm729_vm5, 0.0, %v1903_v4  ;;  %v2185_v13 = vsel %vm729_vm5, %v1903_v4, %v1884_v25 }
 0x2f5   : > { %v2201_v24 = vrot.slane %v1908_v12, 4  ;;  %v2190_v8 = vrot.slane %v1904_v47, 4  ;;  %v2189_v53 = vperm.slane %v2185_v13, %v4266_v41  ;;  %v2200_v27 = vperm.slane %v2196_v32, %v4266_v41 }
 0x2f6   : > { %v2099_v22 = vrot.slane %v2087_v33, 4  ;;  %v2155_v21 = vrot.slane %v2135_v30, 4  ;;  %v2092_v9 = vperm.slane %v2088_v34, %v4266_v41  ;;  %v2111_v7 = vrot.slane %v5125_v59, 4 }
 0x2f7   : > { %v2202_v3 = vsel %vm729_vm5, %v2201_v24, %v1906_v48  ;;  %v2191_v38 = vsel %vm729_vm5, %v2190_v8, %v1902_v56  ;;  %v2209_v0 = vrot.slane %v2189_v53, 4  ;;  %v2221_v29 = vrot.slane %v2200_v27, 4 }
 0x2f8   : > { %v2206_v6 = vperm.slane %v2202_v3, %v4266_v41  ;;  %v2195_v16 = vperm.slane %v2191_v38, %v4266_v41  ;;  %v2100_v63 = vsel %vm729_vm5, %v2099_v22, %v2081_v61  ;;  %v2177_v55 = vrot.slane %v2172_v60, 4 }
 0x2f9   : > { %v2106_v25 = vperm.slane %v2100_v63, %v4286_v58  ;;  %v2112_v31 = vsel %vm729_vm5, %v2111_v7, %v2092_v9  ;;  %v2156_v62 = vsel %vm729_vm5, %v5074_v26, %v2155_v21  ;;  %v2179_v57 = vrot.slane %v2160_v17, 4 }
 0x2fa   : > { %v2219_v14 = vrot.slane %v2206_v6, 4  ;;  %v2207_v50 = vrot.slane %v2195_v16, 4  ;;  %v2210_v36 = vsel %vm729_vm5, %v2195_v16, %v2209_v0  ;;  %v2222_v49 = vsel %vm729_vm5, %v2206_v6, %v2221_v29 }
 0x2fb   : > { %v2218_v5 = vperm.slane %v2210_v36, %v4286_v58  ;;  %v2118_v18 = vperm.slane %v2112_v31, %v4286_v58  ;;  %v2230_v52 = vperm.slane %v2222_v49, %v4286_v58  ;;  %v2164_v28 = vperm.slane %v2156_v62, %v4286_v58 }
 0x2fc   : > { %v2220_v46 = vsel %vm729_vm5, %v2219_v14, %v2200_v27  ;;  %v2208_v20 = vsel %vm729_vm5, %v2207_v50, %v2189_v53  ;;  %v2167_v42 = vrot.slane %v5090_v44, 4  ;;  %v2125_v2 = vrot.slane %v2106_v25, 4 }
 0x2fd   : > { %v2226_v40 = vperm.slane %v2220_v46, %v4286_v58  ;;  %v2214_v10 = vperm.slane %v2208_v20, %v4286_v58  ;;  %v2123_v39 = vrot.slane %v2118_v18, 4  ;;  %v2237_v4 = vrot.slane %v2218_v5, 4  ;;  %v5156_v13 = vpop.permute.xlu0 %3567 }
 0x2fe   : > { %v5146_v30 = vpop.permute.xlu1 %3577  ;;  %v2178_v48 = vsel %vm729_vm5, %v2177_v55, %v2160_v17  ;;  %v2235_v26 = vrot.slane %v2230_v52, 4  ;;  %v2180_v12 = vsel %vm729_vm5, %v2172_v60, %v2179_v57  ;;  %v2168_v44 = vsel %vm729_vm5, %v5078_v35, %v2167_v42 }
 0x2ff   : > { %v2231_v15 = vrot.slane %v2226_v40, 4  ;;  %v2233_v54 = vrot.slane %v2214_v10, 4  ;;  %v2183_v32 = vrot.slane %v2164_v28, 4  ;;  %v2124_v51 = vsel %vm729_vm5, %v2123_v39, %v2106_v25 }
 0x300   : > { %v2176_v47 = vperm.slane %v2168_v44, %v4286_v58  ;;  %v2101_v24 = vrot.slane %v2081_v61, 4  ;;  %v2126_v8 = vsel %vm729_vm5, %v2118_v18, %v2125_v2  ;;  %v2238_v53 = vsel %vm729_vm5, %v2230_v52, %v2237_v4 }
 0x301   : > { %v2232_v19 = vsel %vm729_vm5, %v2231_v15, %v2214_v10  ;;  %v2234_v37 = vsel %vm729_vm5, %v2226_v40, %v2233_v54  ;;  %v2113_v27 = vrot.slane %v2092_v9, 4  ;;  %v2236_v60 = vsel %vm729_vm5, %v2235_v26, %v2218_v5 }
 0x302   : > { %2747 = vmatpush.msrb.mxu0 %v2232_v19  ;;  %2770 = vmatpush.msrb.mxu3 %v2234_v37  ;;  %v2181_v35 = vrot.slane %v2176_v47, 4  ;;  %v2102_v23 = vsel %vm729_vm5, %v2087_v33, %v2101_v24  ;;  %v2184_v56 = vsel %vm729_vm5, %v2176_v47, %v2183_v32  ;;  %v3534_v3 = vunpack.i.l.bf16 %v4950_v45 }
 0x303   : > { %v2110_v6 = vperm.slane %v2102_v23, %v4286_v58  ;;  %v2114_v34 = vsel %vm729_vm5, %v5125_v59, %v2113_v27  ;;  %v3535_v22 = vunpack.i.h.bf16 %v4950_v45  ;;  %v3569_v50 = vunpack.i.l.bf16 %v5156_v13 }
 0x304   : > { %2748 = vmatpush.msrb.mxu0 %v2178_v48  ;;  %2771 = vmatpush.msrb.mxu3 %v2180_v12  ;;  %v2182_v1 = vsel %vm729_vm5, %v2181_v35, %v2164_v28  ;;  %v2023_v16 = vrot.slane %v3534_v3, 4  ;;  %v2122_v33 = vperm.slane %v2114_v34, %v4286_v58  ;;  %v3580_v46 = vunpack.i.h.bf16 %v5146_v30 }
 0x305   : > { %v2129_v11 = vrot.slane %v2110_v6, 4  ;;  %v1967_v45 = vrot.slane %v3535_v22, 4  ;;  %v3570_v55 = vunpack.i.h.bf16 %v5156_v13  ;;  %v1923_v25 = vrot.slane %v3569_v50, 4 }
 0x306   : > { %2749 = vmatpush.msrb.mxu0 %v2124_v51  ;;  %2772 = vmatpush.msrb.mxu3 %v2126_v8  ;;  %v2127_v36 = vrot.slane %v2122_v33, 4  ;;  %v3579_v31 = vunpack.i.l.bf16 %v5146_v30  ;;  %v1921_v57 = vrot.slane %v3580_v46, 4 }
 0x307   : > { %v2130_v9 = vsel %vm729_vm5, %v2122_v33, %v2129_v11  ;;  %v1909_v47 = vrot.slane %v3570_v55, 4  ;;  %v1924_v13 = vsel %vm729_vm5, %v3580_v46, %v1923_v25 }
 0x308   : > { %2816 = vmatpush.msra.mxu0 %v2238_v53  ;;  %2793 = vmatpush.msra.mxu3 %v2236_v60  ;;  %v3573_v29 = vpop.permute.xlu0 %3572  ;;  %v2128_v20 = vsel %vm729_vm5, %v2127_v36, %v2110_v6  ;;  %v1977_v4 = vrot.slane %v3579_v31, 4  ;;  %v1922_v24 = vsel %vm729_vm5, %v1921_v57, %v3569_v50  ;;  %v1932_v6 = vperm.slane %v1924_v13, %v4266_v41 }
 0x309   : > { %v3575_v63 = vunpack.i.h.bf16 %v3573_v29  ;;  %v3574_v42 = vunpack.i.l.bf16 %v3573_v29 }
 0x30a   : > { %v3583_v43 = vpop.permute.xlu1 %3582  ;;  %2817 = vmatpush.msra.mxu0 %v2184_v56  ;;  %2794 = vmatpush.msra.mxu3 %v2182_v1 }
 0x30b   : > { %v3585_v38 = vunpack.i.h.bf16 %v3583_v43  ;;  %v3584_v0 = vunpack.i.l.bf16 %v3583_v43  ;;  %v1979_v28 = vrot.slane %v3575_v63, 4  ;;  %v1978_v8 = vsel %vm729_vm5, %v1977_v4, %v3575_v63 }
 0x30c   : > { %2818 = vmatpush.msra.mxu0 %v2130_v9  ;;  %2795 = vmatpush.msra.mxu3 %v2128_v20  ;;  %v1911_v27 = vrot.slane %v3574_v42, 4  ;;  %v1910_v35 = vsel %vm729_vm5, %v1909_v47, %v3574_v42  ;;  %v1928_v43 = vperm.slane %v1922_v24, %v4266_v41  ;;  %v1984_v34 = vperm.slane %v1978_v8, %v4266_v41 }
 0x30d   : > { %v2021_v61 = vrot.slane %v3585_v38, 4  ;;  %v2024_v14 = vsel %vm729_vm5, %v3585_v38, %v2023_v16  ;;  %v2035_v7 = vrot.slane %v3584_v0, 4  ;;  %v1980_v53 = vsel %vm729_vm5, %v3579_v31, %v1979_v28 }
 0x30e   : > { %v2032_v59 = vperm.slane %v2024_v14, %v4266_v41  ;;  %v1988_v16 = vperm.slane %v1980_v53, %v4266_v41  ;;  %v1916_v33 = vperm.slane %v1910_v35, %v4266_v41  ;;  %v1989_v46 = vrot.slane %v1984_v34, 4 }
 0x30f   : > { %v2022_v17 = vsel %vm729_vm5, %v2021_v61, %v3534_v3  ;;  %v1912_v61 = vsel %vm729_vm5, %v3570_v55, %v1911_v27 }
 0x310   : > { %v2028_v49 = vperm.slane %v2022_v17, %v4266_v41  ;;  %v2059_v18 = vrot.slane %v2032_v59, 4  ;;  %v1933_v17 = vrot.slane %v1928_v43, 4  ;;  %v1935_v63 = vrot.slane %v1916_v33, 4 }
 0x312   : > { %v2047_v39 = vrot.slane %v2028_v49, 4  ;;  %v1934_v9 = vsel %vm729_vm5, %v1933_v17, %v1916_v33 }
 0x313   : > { %v3588_v21 = vpop.permute.xlu1 %3587 }
 0x314   : > { %v3590_v40 = vunpack.i.h.bf16 %v3588_v21  ;;  %v3589_v10 = vunpack.i.l.bf16 %v3588_v21  ;;  %v1945_v21 = vrot.slane %v1932_v6, 4 }
 0x316   : > { %v2033_v5 = vrot.slane %v3590_v40, 4  ;;  %v2036_v15 = vsel %vm729_vm5, %v3590_v40, %v2035_v7  ;;  %v1965_v52 = vrot.slane %v3589_v10, 4  ;;  %v1968_v62 = vsel %vm729_vm5, %v3589_v10, %v1967_v45 }
 0x317   : > { %v2044_v54 = vperm.slane %v2036_v15, %v4266_v41  ;;  %v1976_v26 = vperm.slane %v1968_v62, %v4266_v41  ;;  %v2001_v15 = vrot.slane %v1988_v16, 4 }
 0x318   : > { %v2034_v19 = vsel %vm729_vm5, %v2033_v5, %v3584_v0  ;;  %v1966_v48 = vsel %vm729_vm5, %v1965_v52, %v3535_v22 }
 0x319   : > { %v2040_v37 = vperm.slane %v2034_v19, %v4266_v41  ;;  %v2057_v2 = vrot.slane %v2044_v54, 4  ;;  %v2060_v30 = vsel %vm729_vm5, %v2044_v54, %v2059_v18  ;;  %v1972_v60 = vperm.slane %v1966_v48, %v4266_v41 }
 0x31a   : > { %v2068_v51 = vperm.slane %v2060_v30, %v4286_v58  ;;  %v2003_v23 = vrot.slane %v1976_v26, 4  ;;  %v1936_v30 = vsel %vm729_vm5, %v1928_v43, %v1935_v63 }
 0x31b   : > { %v2045_v12 = vrot.slane %v2040_v37, 4  ;;  %v2048_v44 = vsel %vm729_vm5, %v2040_v37, %v2047_v39  ;;  %v2058_v32 = vsel %vm729_vm5, %v2057_v2, %v2032_v59  ;;  %v1991_v11 = vrot.slane %v1972_v60, 4 }
 0x31c   : > { %v2056_v56 = vperm.slane %v2048_v44, %v4286_v58  ;;  %v2064_v3 = vperm.slane %v2058_v32, %v4286_v58  ;;  %v2075_v38 = vrot.slane %v2068_v51, 4  ;;  %v2004_v14 = vsel %vm729_vm5, %v1988_v16, %v2003_v23 }
 0x31d   : > { %v2046_v1 = vsel %vm729_vm5, %v2045_v12, %v2028_v49  ;;  %v1920_v59 = vperm.slane %v1912_v61, %v4266_v41  ;;  %v1992_v7 = vsel %vm729_vm5, %v1984_v34, %v1991_v11  ;;  %v2012_v20 = vperm.slane %v2004_v14, %v4286_v58 }
 0x31e   : > { %v2076_v0 = vsel %vm729_vm5, 0.0, %v2075_v38  ;;  %v2052_v22 = vperm.slane %v2046_v1, %v4286_v58  ;;  %v2071_v29 = vrot.slane %v2056_v56, 4  ;;  %v2073_v50 = vrot.slane %v2064_v3, 4 }
 0x31f   : > { %v2363_v36 = vrot.slane %v2076_v0, 4  ;;  %v2358_v31 = vsel %vm729_vm5, %v2075_v38, %v2064_v3  ;;  %v1946_v54 = vsel %vm729_vm5, %v1945_v21, %v1920_v59  ;;  %v1947_v57 = vrot.slane %v1920_v59, 4 }
 0x320   : > { %v2069_v40 = vrot.slane %v2052_v22, 4  ;;  %v2072_v45 = vsel %vm729_vm5, 0.0, %v2071_v29  ;;  %v2074_v55 = vsel %vm729_vm5, 0.0, %v2073_v50  ;;  %v2347_v49 = vsel %vm729_vm5, %v2071_v29, %v2052_v22 }
 0x321   : > { %v2351_v10 = vperm.slane %v2347_v49, %v4266_v41  ;;  %v2352_v25 = vrot.slane %v2072_v45, 4  ;;  %v2364_v5 = vsel %vm729_vm5, %v2363_v36, %v2074_v55  ;;  %v2362_v52 = vperm.slane %v2358_v31, %v4266_v41 }
 0x322   : > { %v2070_v18 = vsel %vm729_vm5, 0.0, %v2069_v40  ;;  %v2368_v62 = vperm.slane %v2364_v5, %v4266_v41  ;;  %v2000_v19 = vperm.slane %v1992_v7, %v4286_v58  ;;  %v2002_v39 = vsel %vm729_vm5, %v2001_v15, %v1976_v26 }
 0x323   : > { %v2353_v28 = vsel %vm729_vm5, %v2352_v25, %v2070_v18  ;;  %v2371_v42 = vrot.slane %v2351_v10, 4  ;;  %v2383_v2 = vrot.slane %v2362_v52, 4  ;;  %v1990_v4 = vsel %vm729_vm5, %v1989_v46, %v1972_v60 }
 0x324   : > { %v2357_v37 = vperm.slane %v2353_v28, %v4266_v41  ;;  %v2019_v48 = vrot.slane %v2012_v20, 4  ;;  %v1940_v12 = vperm.slane %v1934_v9, %v4286_v58  ;;  %v5231_v44 = vperm.slane %v1946_v54, %v4286_v58 }
 0x325   : > { %v2384_v51 = vsel %vm729_vm5, %v2368_v62, %v2383_v2  ;;  %v1948_v47 = vsel %vm729_vm5, %v1932_v6, %v1947_v57  ;;  %v2008_v26 = vperm.slane %v2002_v39, %v4286_v58  ;;  %v1944_v8 = vperm.slane %v1936_v30, %v4286_v58 }
 0x326   : > { %v2372_v32 = vsel %vm729_vm5, %v2357_v37, %v2371_v42  ;;  %v5241_v13 = vperm.slane %v2384_v51, %v4286_v58  ;;  %v1996_v53 = vperm.slane %v1990_v4, %v4286_v58  ;;  %v2015_v27 = vrot.slane %v2000_v19, 4 }
 0x327   : > { %v5238_v24 = vperm.slane %v2372_v32, %v4286_v58  ;;  %v2020_v60 = vsel %vm729_vm5, 0.0, %v2019_v48  ;;  %v2369_v35 = vrot.slane %v2357_v37, 4  ;;  %v2381_v23 = vrot.slane %v2368_v62, 4 }
 0x328   : > { %v2397_v56 = vrot.slane %v5241_v13, 4  ;;  %v1956_v3 = vperm.slane %v1948_v47, %v4286_v58  ;;  %v1957_v43 = vrot.slane %v1940_v12, 4  ;;  %v2017_v38 = vrot.slane %v2008_v26, 4 }
 0x329   : > { %v1959_v34 = vrot.slane %v1944_v8, 4  ;;  %v1961_v16 = vrot.slane %v5231_v44, 4  ;;  %v2309_v61 = vrot.slane %v2020_v60, 4  ;;  %v2370_v11 = vsel %vm729_vm5, %v2369_v35, %v2351_v10 }
 0x32a   : > { %v2398_v6 = vsel %vm729_vm5, %v2397_v56, %v5238_v24  ;;  %v2382_v0 = vsel %vm729_vm5, %v2381_v23, %v2362_v52  ;;  %v2013_v14 = vrot.slane %v1996_v53, 4  ;;  %v2016_v22 = vsel %vm729_vm5, 0.0, %v2015_v27 }
 0x32b   : > { %2885 = vmatpush.msrb.mxu1 %v2398_v6  ;;  %v1963_v29 = vrot.slane %v1956_v3, 4  ;;  %v5259_v50 = vperm.slane %v2370_v11, %v4286_v58  ;;  %v5262_v17 = vperm.slane %v2382_v0, %v4286_v58  ;;  %v2293_v36 = vsel %vm729_vm5, %v2015_v27, %v1996_v53 }
 0x32c   : > { %v2018_v21 = vsel %vm729_vm5, 0.0, %v2017_v38  ;;  %v2297_v46 = vperm.slane %v2293_v36, %v4266_v41  ;;  %v2298_v59 = vrot.slane %v2016_v22, 4  ;;  %v2304_v9 = vsel %vm729_vm5, %v2019_v48, %v2008_v26 }
 0x32d   : > { %v2393_v63 = vrot.slane %v5262_v17, 4  ;;  %v2014_v7 = vsel %vm729_vm5, 0.0, %v2013_v14  ;;  %v2308_v20 = vperm.slane %v2304_v9, %v4266_v41  ;;  %v2310_v40 = vsel %vm729_vm5, %v2309_v61, %v2018_v21 }
 0x32e   : > { %v2299_v45 = vsel %vm729_vm5, %v2298_v59, %v2014_v7  ;;  %v2314_v55 = vperm.slane %v2310_v40, %v4266_v41  ;;  %v2317_v49 = vrot.slane %v2297_v46, 4  ;;  %v1960_v10 = vsel %vm729_vm5, 0.0, %v1959_v34 }
 0x32f   : > { %v2394_v25 = vsel %vm729_vm5, %v2393_v63, %v5259_v50  ;;  %v2303_v31 = vperm.slane %v2299_v45, %v4266_v41  ;;  %v2329_v5 = vrot.slane %v2308_v20, 4  ;;  %v1958_v15 = vsel %vm729_vm5, 0.0, %v1957_v43 }
 0x330   : > { %2839 = vmatpush.msrb.mxu2 %v2394_v25  ;;  %v2327_v18 = vrot.slane %v2314_v55, 4  ;;  %v1964_v52 = vsel %vm729_vm5, 0.0, %v1963_v29  ;;  %v2239_v62 = vsel %vm729_vm5, %v1959_v34, %v1940_v12  ;;  %v2244_v54 = vrot.slane %v1960_v10, 4 }
 0x331   : > { %v5248_v1 = vpop.f32.mrf.mxu0  ;;  %v2318_v57 = vsel %vm729_vm5, %v2303_v31, %v2317_v49  ;;  %v2330_v28 = vsel %vm729_vm5, %v2314_v55, %v2329_v5  ;;  %v2315_v42 = vrot.slane %v2303_v31, 4  ;;  %v2243_v19 = vperm.slane %v2239_v62, %v4266_v41 }
 0x332   : > { %v2665_v33 = vsel %vm2658_vm7, %v5248_v1, -inf  ;;  %v2326_v2 = vperm.slane %v2318_v57, %v4286_v58  ;;  %v2338_v30 = vperm.slane %v2330_v28, %v4286_v58  ;;  %v2328_v4 = vsel %vm729_vm5, %v2327_v18, %v2308_v20 }
 0x333   : > { %2666 = vmax.xlane.f32.xlu1 %v2665_v33  ;;  %v2245_v48 = vsel %vm729_vm5, %v2244_v54, %v1958_v15  ;;  %v2316_v51 = vsel %vm729_vm5, %v2315_v42, %v2297_v46  ;;  %v2334_v47 = vperm.slane %v2328_v4, %v4286_v58  ;;  %v2250_v27 = vsel %vm729_vm5, %v1963_v29, %v5231_v44 }
 0x334   : > { %v2343_v26 = vrot.slane %v2338_v30, 4  ;;  %v2322_v8 = vperm.slane %v2316_v51, %v4286_v58  ;;  %v2249_v53 = vperm.slane %v2245_v48, %v4266_v41  ;;  %v2254_v35 = vperm.slane %v2250_v27, %v4266_v41 }
 0x335   : > { %v2339_v60 = vrot.slane %v2334_v47, 4  ;;  %v2255_v23 = vrot.slane %v1964_v52, 4  ;;  %v2263_v56 = vrot.slane %v2243_v19, 4  ;;  %v1962_v43 = vsel %vm729_vm5, 0.0, %v1961_v16 }
 0x336   : > { %v2344_v3 = vsel %vm729_vm5, %v2343_v26, %v2326_v2  ;;  %v2261_v38 = vrot.slane %v2249_v53, 4  ;;  %v2275_v33 = vrot.slane %v2254_v35, 4  ;;  %v2399_v40 = vrot.slane %v5238_v24, 4 }
 0x337   : > { %2886 = vmatpush.msrb.mxu1 %v2344_v3  ;;  %v2340_v6 = vsel %vm729_vm5, %v2339_v60, %v2322_v8  ;;  %v2256_v34 = vsel %vm729_vm5, %v2255_v23, %v1962_v43  ;;  %v2264_v61 = vsel %vm729_vm5, %v2249_v53, %v2263_v56  ;;  %v2395_v31 = vrot.slane %v5259_v50, 4 }
 0x338   : > { %2840 = vmatpush.msrb.mxu2 %v2340_v6  ;;  %v2260_v44 = vperm.slane %v2256_v34, %v4266_v41  ;;  %v2272_v11 = vperm.slane %v2264_v61, %v4286_v58  ;;  %v2262_v0 = vsel %vm729_vm5, %v2261_v38, %v2243_v19  ;;  %v2400_v25 = vsel %vm729_vm5, %v5241_v13, %v2399_v40 }
 0x339   : > { %v2268_v14 = vperm.slane %v2262_v0, %v4286_v58  ;;  %v2345_v5 = vrot.slane %v2326_v2, 4  ;;  %v2396_v15 = vsel %vm729_vm5, %v5262_v17, %v2395_v31  ;;  %v2341_v18 = vrot.slane %v2322_v8, 4 }
 0x33a   : > { %v2276_v16 = vsel %vm729_vm5, %v2260_v44, %v2275_v33  ;;  %v2273_v22 = vrot.slane %v2260_v44, 4  ;;  %v2291_v29 = vrot.slane %v2272_v11, 4 }
 0x33b   : > { %v5284_v39 = vpop.f32.mrf.mxu2  ;;  %v5286_v37 = vpop.f32.mrf.mxu3  ;;  %v2284_v21 = vperm.slane %v2276_v16, %v4286_v58  ;;  %v2287_v46 = vrot.slane %v2268_v14, 4  ;;  %v2346_v24 = vsel %vm729_vm5, %v2338_v30, %v2345_v5  ;;  %v2342_v52 = vsel %vm729_vm5, %v2334_v47, %v2341_v18 }
 0x33c   : > { %v2659_v12 = vsel %vm2658_vm7, %v5284_v39, -inf  ;;  %v2662_v32 = vsel %vm2658_vm7, %v5286_v37, -inf  ;;  %v2274_v9 = vsel %vm729_vm5, %v2273_v22, %v2254_v35 }
 0x33d   : > { %2660 = vmax.xlane.f32.xlu0 %v2659_v12  ;;  %2663 = vmax.xlane.f32.xlu2 %v2662_v32  ;;  %v2289_v63 = vrot.slane %v2284_v21, 4  ;;  %v2280_v7 = vperm.slane %v2274_v9, %v4286_v58  ;;  %v2292_v20 = vsel %vm729_vm5, %v2284_v21, %v2291_v29 }
 0x33f   : > { %v2290_v45 = vsel %vm729_vm5, %v2289_v63, %v2272_v11  ;;  %v2285_v55 = vrot.slane %v2280_v7, 4  ;;  %v2288_v49 = vsel %vm729_vm5, %v2280_v7, %v2287_v46 }
 0x340   : > { %2887 = vmatpush.msrb.mxu1 %v2290_v45 }
 0x341   : > { %v2286_v10 = vsel %vm729_vm5, %v2285_v55, %v2268_v14 }
 0x342   : > { %2841 = vmatpush.msrb.mxu2 %v2286_v10 }
 0x344   : > { %v2527_v36 = vpop.f32.mrf.mxu2 }
 0x345   : > { %v2668_v59 = vsel %vm2658_vm7, %v2527_v36, -inf }
 0x346   : > { %2669 = vmax.xlane.f32.xlu2 %v2668_v59 }
 0x354   : > { %v2591_v62 = vpop.f32.mrf.mxu0 }
 0x355   : > { %v2623_v54 = vpop.f32.mrf.mxu2  ;;  %v2674_v57 = vsel %vm2658_vm7, %v2591_v62, -inf }
 0x356   : > { %2675 = vmax.xlane.f32.xlu2 %v2674_v57  ;;  %v2677_v28 = vsel %vm2658_vm7, %v2623_v54, -inf }
 0x357   : > { %2678 = vmax.xlane.f32.xlu0 %v2677_v28 }
 0x358   : > { %v2559_v13 = vpop.f32.mrf.mxu3 }
 0x359   : > { %v2671_v50 = vsel %vm2658_vm7, %v2559_v13, -inf }
 0x35e   : > { %2672 = vmax.xlane.f32.xlu2 %v2671_v50 }
 0x362   : > { %v2655_v42 = vpop.f32.mrf.mxu3 }
 0x363   : > { %v2680_v17 = vsel %vm2658_vm7, %v2655_v42, -inf }
 0x366   : > { %2681 = vmax.xlane.f32.xlu2 %v2680_v17 }
 0x3a6   : > { %v2667_v19 = vpop.xlane.xlu1 %2666 }
 0x3a7   : > { %v2685_v2 = vsub.f32 %v5248_v1, %v2667_v19 }
 0x3a9   : > { %v2695_v30 = vmul.f32 1.442695, %v2685_v2 }
 0x3ab   : > { %3609 = vpow2.f32 %v2695_v30 }
 0x3b0   : > { %v2661_v4 = vpop.xlane.xlu0 %2660  ;;  %v2664_v48 = vpop.xlane.xlu2 %2663 }
 0x3b1   : > { %v3610_v12 = vpop.eup %3609  ;;  %v2683_v32 = vsub.f32 %v5284_v39, %v2661_v4  ;;  %v2684_v51 = vsub.f32 %v5286_v37, %v2664_v48 }
 0x3b2   : > { %v2713_v47 = vsel %vm2658_vm7, %v3610_v12, 0.0 }
 0x3b3   : > { %v2691_v26 = vmul.f32 1.442695, %v2683_v32  ;;  %v2693_v8 = vmul.f32 1.442695, %v2684_v51  ;;  %2714 = vadd.xlane.f32.xlu1 %v2713_v47 }
 0x3b5   : > { %3611 = vpow2.f32 %v2691_v26 }
 0x3b6   : > { %3613 = vpow2.f32 %v2693_v8 }
 0x3b9   : > { %v2670_v53 = vpop.xlane.xlu2 %2669 }
 0x3ba   : > { %v2686_v27 = vsub.f32 %v2527_v36, %v2670_v53 }
 0x3bb   : > { %v3612_v60 = vpop.eup %3611 }
 0x3bc   : > { %v3614_v1 = vpop.eup %3613  ;;  %v2697_v35 = vmul.f32 1.442695, %v2686_v27  ;;  %3417 = vmatmul.msk.f32.vlgmr.msrb.gmra.mxu0 %vm2658_vm7, %v3612_v60  ;;  %v2707_v23 = vsel %vm2658_vm7, %v3612_v60, 0.0 }
 0x3bd   : > { %2908 = vmatpush.msrb.mxu0 %v2400_v25  ;;  %2708 = vadd.xlane.f32.xlu0 %v2707_v23  ;;  %v2710_v39 = vsel %vm2658_vm7, %v3614_v1, 0.0 }
 0x3be   : > { %3615 = vpow2.f32 %v2697_v35  ;;  %3418 = vmatmul.msk.f32.vlgmr.msrb.gmra.mxu3 %vm2658_vm7, %v3614_v1  ;;  %2711 = vadd.xlane.f32.xlu1 %v2710_v39 }
 0x3bf   : > { %2862 = vmatpush.msrb.mxu3 %v2396_v15  ;;  %2909 = vmatpush.msrb.mxu0 %v2346_v24 }
 0x3c1   : > { %2863 = vmatpush.msrb.mxu3 %v2342_v52  ;;  %2910 = vmatpush.msrb.mxu0 %v2292_v20 }
 0x3c3   : > { %2864 = vmatpush.msrb.mxu3 %v2288_v49 }
 0x3c4   : > { %v3616_v37 = vpop.eup %3615 }
 0x3c5   : > { %3420 = vmatmul.msk.f32.vlgmr.msra.gmra.mxu0 %vm2658_vm7, %v3616_v37  ;;  %v2716_v56 = vsel %vm2658_vm7, %v3616_v37, 0.0 }
 0x3c6   : > { %3419 = vmatmul.msk.f32.vlgmr.msra.gmra.mxu3 %vm2658_vm7, %v3610_v12  ;;  %2717 = vadd.xlane.f32.xlu2 %v2716_v56 }
 0x3c9   : > { %v2676_v3 = vpop.xlane.xlu2 %2675 }
 0x3ca   : > { %v2688_v43 = vsub.f32 %v2591_v62, %v2676_v3  ;;  %v2679_v38 = vpop.xlane.xlu0 %2678 }
 0x3cb   : > { %v2689_v6 = vsub.f32 %v2623_v54, %v2679_v38 }
 0x3cc   : > { %v2701_v34 = vmul.f32 1.442695, %v2688_v43 }
 0x3cd   : > { %v2703_v61 = vmul.f32 1.442695, %v2689_v6 }
 0x3ce   : > { %3617 = vpow2.f32 %v2701_v34 }
 0x3cf   : > { %3619 = vpow2.f32 %v2703_v61 }
 0x3d1   : > { %v2673_v33 = vpop.xlane.xlu2 %2672 }
 0x3d2   : > { %v2687_v44 = vsub.f32 %v2559_v13, %v2673_v33 }
 0x3d4   : > { %v3618_v11 = vpop.eup %3617  ;;  %v2699_v0 = vmul.f32 1.442695, %v2687_v44 }
 0x3d5   : > { %v3620_v14 = vpop.eup %3619  ;;  %3422 = vmatmul.msk.f32.vlgmr.msrb.gmra.mxu3 %vm2658_vm7, %v3618_v11  ;;  %v2722_v59 = vsel %vm2658_vm7, %v3618_v11, 0.0 }
 0x3d6   : > { %3621 = vpow2.f32 %v2699_v0  ;;  %3423 = vmatmul.msk.f32.vlgmr.msrb.gmra.mxu1 %vm2658_vm7, %v3620_v14  ;;  %v2725_v16 = vsel %vm2658_vm7, %v3620_v14, 0.0 }
 0x3d7   : > { %2726 = vadd.xlane.f32.xlu0 %v2725_v16 }
 0x3d9   : > { %v2682_v22 = vpop.xlane.xlu2 %2681 }
 0x3da   : > { %v2690_v29 = vsub.f32 %v2655_v42, %v2682_v22 }
 0x3dc   : > { %v3622_v36 = vpop.eup %3621  ;;  %v2705_v21 = vmul.f32 1.442695, %v2690_v29 }
 0x3dd   : > { %3421 = vmatmul.msk.f32.vlgmr.msrb.gmra.mxu2 %vm2658_vm7, %v3622_v36  ;;  %v2719_v46 = vsel %vm2658_vm7, %v3622_v36, 0.0 }
 0x3de   : > { %3623 = vpow2.f32 %v2705_v21  ;;  %2720 = vadd.xlane.f32.xlu2 %v2719_v46 }
 0x3df   : > { %2723 = vadd.xlane.f32.xlu0 %v2722_v59 }
 0x3e4   : > { %v3624_v9 = vpop.eup %3623 }
 0x3e5   : > { %3424 = vmatmul.msk.f32.vlgmr.msrb.gmra.mxu0 %vm2658_vm7, %v3624_v9  ;;  %v2728_v63 = vsel %vm2658_vm7, %v3624_v9, 0.0 }
 0x3e6   : > { %2729 = vadd.xlane.f32.xlu1 %v2728_v63 }
 0x426   : > { %v2715_v7 = vpop.xlane.xlu1 %2714 }
 0x430   : > { %v2709_v55 = vpop.xlane.xlu0 %2708 }
 0x431   : > { %v2712_v20 = vpop.xlane.xlu1 %2711 }
 0x432   : > { %3625 = vrcp.f32 %v2712_v20 }
 0x438   : > { %v3626_v49 = vpop.eup %3625 }
 0x439   : > { %v2718_v40 = vpop.xlane.xlu2 %2717  ;;  %v2751_v45 = vpop.f32.mrf.mxu0 }
 0x43a   : > { %3627 = vrcp.f32 %v2718_v40 }
 0x43b   : > { %3629 = vrcp.f32 %v2709_v55 }
 0x43c   : > { %3631 = vrcp.f32 %v2715_v7 }
 0x440   : > { %v3628_v25 = vpop.eup %3627 }
 0x441   : > { %v2774_v10 = vpop.f32.mrf.mxu3  ;;  %v3630_v18 = vpop.eup %3629 }
 0x442   : > { %v2924_v31 = vmul.f32 %v3626_v49, %v2774_v10  ;;  %v2820_v5 = vpop.f32.mrf.mxu0  ;;  %v2923_v62 = vmul.f32 %v3630_v18, %v2751_v45  ;;  %v3632_v28 = vpop.eup %3631 }
 0x443   : > { %v2926_v15 = vmul.f32 %v3628_v25, %v2820_v5 }
 0x444   : > { %v2945_v24 = vrot.slane %v2924_v31, 4  ;;  %v2933_v17 = vrot.slane %v2923_v62, 4 }
 0x445   : > { %v2943_v52 = vrot.slane %v2926_v15, 4 }
 0x446   : > { %v2946_v54 = vsel %vm729_vm5, %v2926_v15, %v2945_v24 }
 0x447   : > { %v2944_v57 = vsel %vm729_vm5, %v2943_v52, %v2924_v31  ;;  %v2954_v50 = vperm.slane %v2946_v54, %v4266_v41 }
 0x448   : > { %v2950_v2 = vperm.slane %v2944_v57, %v4266_v41 }
 0x449   : > { %v2797_v42 = vpop.f32.mrf.mxu3  ;;  %v2967_v48 = vrot.slane %v2954_v50, 4 }
 0x44a   : > { %v2727_v13 = vpop.xlane.xlu0 %2726  ;;  %v2925_v19 = vmul.f32 %v3632_v28, %v2797_v42  ;;  %v2955_v51 = vrot.slane %v2950_v2, 4 }
 0x44b   : > { %3633 = vrcp.f32 %v2727_v13 }
 0x44c   : > { %v2931_v30 = vrot.slane %v2925_v19, 4  ;;  %v2934_v4 = vsel %vm729_vm5, %v2925_v19, %v2933_v17 }
 0x44d   : > { %v2942_v12 = vperm.slane %v2934_v4, %v4266_v41 }
 0x44e   : > { %v2932_v32 = vsel %vm729_vm5, %v2931_v30, %v2923_v62 }
 0x44f   : > { %v2938_v47 = vperm.slane %v2932_v32, %v4266_v41  ;;  %v2968_v26 = vsel %vm729_vm5, %v2967_v48, %v2942_v12  ;;  %v2969_v8 = vrot.slane %v2942_v12, 4 }
 0x450   : > { %v2974_v1 = vperm.slane %v2968_v26, %v4286_v58 }
 0x451   : > { %v2956_v53 = vsel %vm729_vm5, %v2955_v51, %v2938_v47  ;;  %v2957_v27 = vrot.slane %v2938_v47, 4  ;;  %v2970_v60 = vsel %vm729_vm5, %v2954_v50, %v2969_v8  ;;  %v2721_v33 = vpop.xlane.xlu2 %2720  ;;  %v3634_v29 = vpop.eup %3633 }
 0x452   : > { %v2724_v35 = vpop.xlane.xlu0 %2723  ;;  %v2962_v23 = vperm.slane %v2956_v53, %v4286_v58  ;;  %v2978_v39 = vperm.slane %v2970_v60, %v4286_v58  ;;  %v2983_v43 = vrot.slane %v2974_v1, 4 }
 0x453   : > { %v2958_v37 = vsel %vm729_vm5, %v2950_v2, %v2957_v27  ;;  %3635 = vrcp.f32 %v2724_v35  ;;  %v2889_v11 = vpop.f32.mrf.mxu1 }
 0x454   : > { %v2966_v56 = vperm.slane %v2958_v37, %v4286_v58  ;;  %v2985_v3 = vrot.slane %v2978_v39, 4  ;;  %v2979_v38 = vrot.slane %v2962_v23, 4  ;;  %v2984_v36 = vsel %vm729_vm5, 0.0, %v2983_v43 }
 0x455   : > { %3637 = vrcp.f32 %v2721_v33  ;;  %v2929_v9 = vmul.f32 %v3634_v29, %v2889_v11 }
 0x456   : > { %v2981_v6 = vrot.slane %v2966_v56, 4  ;;  %v2986_v34 = vsel %vm729_vm5, 0.0, %v2985_v3  ;;  %v3054_v61 = vsel %vm729_vm5, %v2985_v3, %v2974_v1  ;;  %v2980_v7 = vsel %vm729_vm5, 0.0, %v2979_v38 }
 0x457   : > { %v3059_v44 = vrot.slane %v2986_v34, 4  ;;  %v3058_v0 = vperm.slane %v3054_v61, %v4266_v41  ;;  %v2987_v62 = vrot.slane %v2929_v9, 4 }
 0x458   : > { %v2982_v16 = vsel %vm729_vm5, 0.0, %v2981_v6  ;;  %v3043_v22 = vsel %vm729_vm5, %v2981_v6, %v2962_v23  ;;  %v2866_v63 = vpop.f32.mrf.mxu3 }
 0x459   : > { %v2730_v14 = vpop.xlane.xlu1 %2729  ;;  %v3047_v21 = vperm.slane %v3043_v22, %v4266_v41  ;;  %v3048_v46 = vrot.slane %v2982_v16, 4  ;;  %v3636_v59 = vpop.eup %3635  ;;  %v3060_v20 = vsel %vm729_vm5, %v3059_v44, %v2984_v36  ;;  %v3079_v40 = vrot.slane %v3058_v0, 4 }
 0x45a   : > { %3639 = vrcp.f32 %v2730_v14  ;;  %v3064_v55 = vperm.slane %v3060_v20, %v4266_v41  ;;  %v2928_v25 = vmul.f32 %v3636_v59, %v2866_v63 }
 0x45b   : > { %v3049_v45 = vsel %vm729_vm5, %v3048_v46, %v2980_v7  ;;  %v3067_v49 = vrot.slane %v3047_v21, 4  ;;  %v3638_v52 = vpop.eup %3637 }
 0x45c   : > { %v3053_v10 = vperm.slane %v3049_v45, %v4266_v41  ;;  %v3080_v31 = vsel %vm729_vm5, %v3064_v55, %v3079_v40  ;;  %v3077_v5 = vrot.slane %v3064_v55, 4  ;;  %v3001_v2 = vrot.slane %v2928_v25, 4 }
 0x45d   : > { %v3088_v24 = vperm.slane %v3080_v31, %v4286_v58 }
 0x45e   : > { %v3068_v15 = vsel %vm729_vm5, %v3053_v10, %v3067_v49  ;;  %v3065_v18 = vrot.slane %v3053_v10, 4  ;;  %v3078_v28 = vsel %vm729_vm5, %v3077_v5, %v3058_v0 }
 0x45f   : > { %v3076_v57 = vperm.slane %v3068_v15, %v4286_v58  ;;  %v3093_v50 = vrot.slane %v3088_v24, 4  ;;  %v3084_v17 = vperm.slane %v3078_v28, %v4286_v58 }
 0x460   : > { %v2843_v54 = vpop.f32.mrf.mxu2  ;;  %v3066_v42 = vsel %vm729_vm5, %v3065_v18, %v3047_v21  ;;  %v3640_v19 = vpop.eup %3639 }
 0x461   : > { %v2927_v13 = vmul.f32 %v3638_v52, %v2843_v54  ;;  %v3095_v4 = vrot.slane %v3076_v57, 4  ;;  %v3072_v48 = vperm.slane %v3066_v42, %v4286_v58  ;;  %v3094_v47 = vsel %vm729_vm5, %v3093_v50, %v3076_v57 }
 0x462   : > { %v2912_v30 = vpop.f32.mrf.mxu0  ;;  %3161 = vrot.lane.b32.xlu1 %v3094_v47, %s3883_s30  ;;  %v3089_v53 = vrot.slane %v3084_v17, 4 }
 0x463   : > { %v2988_v12 = vsel %vm729_vm5, %v2987_v62, %v2927_v13  ;;  %v2989_v32 = vrot.slane %v2927_v13, 4  ;;  %v2930_v51 = vmul.f32 %v3640_v19, %v2912_v30  ;;  %v3096_v8 = vsel %vm729_vm5, %v3088_v24, %v3095_v4 }
 0x464   : > { %v2994_v26 = vperm.slane %v2988_v12, %v4266_v41  ;;  %v3091_v27 = vrot.slane %v3072_v48, 4  ;;  %3169 = vrot.lane.b32.xlu0 %v3096_v8, %s3884_s24  ;;  %v5402_v3 = vsel %vm729_vm5, %v3089_v53, %v3072_v48  ;;  %v3184_v8 = vld [vmem:[#allocation10 + $0x10] sm:$0xff]  ;;  %v3182_v53 = vld [vmem:[#allocation10] sm:$0xff] }
 0x465   : > { %v2990_v60 = vsel %vm729_vm5, %v2929_v9, %v2989_v32  ;;  %v2999_v1 = vrot.slane %v2930_v51, 4  ;;  %v3002_v35 = vsel %vm729_vm5, %v2930_v51, %v3001_v2 }
 0x466   : > { %v2998_v23 = vperm.slane %v2990_v60, %v4266_v41  ;;  %v3010_v39 = vperm.slane %v3002_v35, %v4266_v41  ;;  %v3092_v37 = vsel %vm729_vm5, %v3084_v17, %v3091_v27  ;;  %v3013_v43 = vrot.slane %v2994_v26, 4 }
 0x467   : > { %v3000_v56 = vsel %vm729_vm5, %v2999_v1, %v2928_v25  ;;  %3153 = vrot.lane.b32.xlu2 %v3092_v37, %s3885_s18 }
 0x468   : > { %v3025_v38 = vrot.slane %v2998_v23, 4  ;;  %v3006_v6 = vperm.slane %v3000_v56, %v4266_v41  ;;  %v3023_v34 = vrot.slane %v3010_v39, 4 }
 0x46a   : > { %v3011_v61 = vrot.slane %v3006_v6, 4  ;;  %v3014_v33 = vsel %vm729_vm5, %v3006_v6, %v3013_v43  ;;  %v3024_v44 = vsel %vm729_vm5, %v3023_v34, %v2998_v23  ;;  %v3026_v11 = vsel %vm729_vm5, %v3010_v39, %v3025_v38 }
 0x46b   : > { %v3022_v0 = vperm.slane %v3014_v33, %v4286_v58  ;;  %v3030_v14 = vperm.slane %v3024_v44, %v4286_v58  ;;  %v3034_v16 = vperm.slane %v3026_v11, %v4286_v58 }
 0x46c   : > { %v3012_v22 = vsel %vm729_vm5, %v3011_v61, %v2994_v26  ;;  %v3185_v26 = vld [vmem:[#allocation10 + $0x18] sm:$0xff] }
 0x46d   : > { %v3018_v29 = vperm.slane %v3012_v22, %v4286_v58  ;;  %v3037_v36 = vrot.slane %v3022_v0, 4  ;;  %v3039_v21 = vrot.slane %v3030_v14, 4  ;;  %v3041_v46 = vrot.slane %v3034_v16, 4  ;;  %3204 = vmatpush.msra.mxu2 %v3185_v26 }
 0x46f   : > { %v3035_v59 = vrot.slane %v3018_v29, 4  ;;  %v3038_v9 = vsel %vm729_vm5, 0.0, %v3037_v36  ;;  %v3042_v63 = vsel %vm729_vm5, 0.0, %v3041_v46  ;;  %v3097_v40 = vsel %vm729_vm5, %v3037_v36, %v3018_v29  ;;  %3205 = vmatpush.msra.mxu2 %v3184_v8 }
 0x470   : > { %v3102_v7 = vrot.slane %v3038_v9, 4  ;;  %v3113_v20 = vrot.slane %v3042_v63, 4  ;;  %v3108_v45 = vsel %vm729_vm5, %v3041_v46, %v3030_v14  ;;  %v3040_v49 = vsel %vm729_vm5, 0.0, %v3039_v21 }
 0x471   : > { %v3036_v55 = vsel %vm729_vm5, 0.0, %v3035_v59  ;;  %v3101_v10 = vperm.slane %v3097_v40, %v4266_v41  ;;  %v3112_v25 = vperm.slane %v3108_v45, %v4266_v41 }
 0x472   : > { %v3103_v31 = vsel %vm729_vm5, %v3102_v7, %v3036_v55  ;;  %v3114_v5 = vsel %vm729_vm5, %v3113_v20, %v3040_v49 }
 0x473   : > { %v3107_v15 = vperm.slane %v3103_v31, %v4266_v41  ;;  %v3118_v24 = vperm.slane %v3114_v5, %v4266_v41  ;;  %v3121_v18 = vrot.slane %v3101_v10, 4  ;;  %v3133_v52 = vrot.slane %v3112_v25, 4 }
 0x475   : > { %v3122_v62 = vsel %vm729_vm5, %v3107_v15, %v3121_v18  ;;  %v3134_v54 = vsel %vm729_vm5, %v3118_v24, %v3133_v52  ;;  %v3119_v57 = vrot.slane %v3107_v15, 4  ;;  %v3131_v28 = vrot.slane %v3118_v24, 4 }
 0x476   : > { %v3130_v13 = vperm.slane %v3122_v62, %v4286_v58  ;;  %v3142_v50 = vperm.slane %v3134_v54, %v4286_v58 }
 0x477   : > { %v3120_v42 = vsel %vm729_vm5, %v3119_v57, %v3101_v10  ;;  %v3132_v17 = vsel %vm729_vm5, %v3131_v28, %v3112_v25 }
 0x478   : > { %v3149_v19 = vrot.slane %v3130_v13, 4  ;;  %v3147_v2 = vrot.slane %v3142_v50, 4  ;;  %v3126_v41 = vperm.slane %v3120_v42, %v4286_v58  ;;  %v3138_v30 = vperm.slane %v3132_v17, %v4286_v58  ;;  %v3183_v58 = vld [vmem:[#allocation10 + $0x8] sm:$0xff] }
 0x479   : > { %3206 = vmatpush.msra.mxu2 %v3183_v58 }
 0x47a   : > { %v3150_v4 = vsel %vm729_vm5, %v3142_v50, %v3149_v19  ;;  %v3148_v48 = vsel %vm729_vm5, %v3147_v2, %v3130_v13  ;;  %v3143_v12 = vrot.slane %v3138_v30, 4  ;;  %v3145_v32 = vrot.slane %v3126_v41, 4 }
 0x47b   : > { %3171 = vrot.lane.b32.xlu1 %v3150_v4, %s3884_s24  ;;  %3163 = vrot.lane.b32.xlu0 %v3148_v48, %s3883_s30 }
 0x47c   : > { %v3146_v51 = vsel %vm729_vm5, %v3138_v30, %v3145_v32  ;;  %v3144_v47 = vsel %vm729_vm5, %v3143_v12, %v3126_v41  ;;  %3207 = vmatpush.msra.mxu2 %v3182_v53 }
 0x47d   : > { %3155 = vrot.lane.b32.xlu2 %v3146_v51, %s3885_s18 }
 0x4c1   : > { %v3154_v27 = vpop.permute.xlu2 %3153 }
 0x4c2   : > { %v3175_v60 = vsel %vm2401_vm6, %v5402_v3, %v3154_v27 }
 0x4d4   : > { %v3162_v1 = vpop.permute.xlu1 %3161 }
 0x4d5   : > { %v3178_v35 = vsel %vm3177_vm8, %v3175_v60, %v3162_v1 }
 0x4d6   : > { %v3170_v23 = vpop.permute.xlu0 %3169 }
 0x4d7   : > { %v3180_v39 = vsel %vm2658_vm7, %v3178_v35, %v3170_v23  ;;  %v3156_v37 = vpop.permute.xlu2 %3155 }
 0x4d8   : > { %3425 = vmatmul.msk.f32.vlgmr.msra.gmra.mxu2 %vm456_vm0, %v3180_v39  ;;  %v3176_v56 = vsel %vm2401_vm6, %v3144_v47, %v3156_v37 }
 0x4ed   : > { %v3172_v43 = vpop.permute.xlu1 %3171  ;;  %v3164_v38 = vpop.permute.xlu0 %3163 }
 0x4ee   : > { %v3179_v6 = vsel %vm3177_vm8, %v3176_v56, %v3164_v38 }
 0x4ef   : > { %v3181_v34 = vsel %vm2658_vm7, %v3179_v6, %v3172_v43 }
 0x4f0   : > { %3426 = vmatmul.msk.f32.gmra.mxu2 %vm456_vm0, %v3181_v34 }
 0x55b   : > { %v3209_v3 = vpop.f32.mrf.mxu2 }
 0x55c   : > { %3215 = vst.msk [vmem:[%s444_s20] sm:$0xff] %vm456_vm0, %v3209_v3 }
 0x573   : > { %v3212_v61 = vpop.f32.mrf.mxu2 }
 0x574   : > { %3216 = vst.msk [vmem:[%s444_s20 + $0x8] sm:$0xff] %vm456_vm0, %v3212_v61 }
 0x575   : > { %3818 = shalt.err (!%p3815_p9)
}
 0x576   : > { %s3886_s6 = smov 128  }
 0x577   : > { %3452 = dma.vmem_to_hbm [thread:$0]  (%p4029_p7), %s3231_s19, 256, %s3233_s11, %s3218_s26, %s3886_s6, %s3886_s6, %s3885_s18  }
 0x578 PF: > { %s5547_s16 = sld [smem:[#allocation17_spill]]  ;;  %p5549_p12 = scmp.ge.s32.totalorder %s3869_s12, 2 }
 0x57a   : > { %p3472_p13 = pnand %p5549_p12, %p3972_p6 }
 0x57c   : > { %p3473_p0 = pneg %p3472_p13 }
 0x57e   : > { %s3247_s30 = sand.u32 1, %s5547_s16  }
 0x57f   : > { %s3248_s24 = scalar_lea.sflag [#allocation4], %s3247_s30 }
 0x580   : > { %3852 = dma.done.wait (%p3473_p0), %s3248_s24, 256  }
 0x581   : > { %3854 = vsyncadd (%p3473_p0), %s3248_s24, 4294967040  ;;  %s5550_s12 = sld [smem:[#allocation20_spill]]  ;;  %s5553_s30 = smov %s3861_s10 }
 0x582   : > { %s5551_s20 = sld [smem:[#allocation18_spill]] }
 0x583   : > { %s5552_s11 = sld [smem:[#allocation21_spill]] }
 0x587   : > { %p26_p3 = scmp.ge.s32.totalorder %s5550_s12, 4  }
 0x588   : > { %s5554_s10 = smov %s5551_s20 }
 0x589   :  { %28 = sbr.rel (!%p26_p3) target bundleno = 12 (0xc), region = 126 }
 0x58e   :  { %3254 = vsyncpa [#allocation3], 1 }
 0x58f   :  { %3256 = vsyncpa [#allocation3 + $0x1], 1 }
 0x590   :  { %3257 = vsyncpa [#allocation6], 1 }
 0x591   :  { %3259 = vsyncpa [#allocation6 + $0x1], 1 }
 0x592   :  { %3260 = vsyncpa [#allocation9], 1 }
 0x593   :  { %3261 = vsyncpa [#allocation4], 1 }
 0x594   :  { %3263 = vsyncpa [#allocation4 + $0x1], 1 }

</bundles_post_ra>
